<compile_context>
chip_gen: v7x
topology: tpu7x:2x2x1
jax: 0.10.0
libtpu: 0.0.40
codegen_flags: <defaults>
</compile_context>

<pallas_src>
import functools

import numpy as np
import jax
import jax.numpy as jnp
from jax import lax
from jax.experimental import pallas as pl
from jax.experimental.pallas import tpu as pltpu


# ----------------------------- Pallas kernel -----------------------------

def upblock_kernel(x1f_ref, x2f_ref, k1w_ref, b1w_ref, uh_ref,
                   m1_ref, sh1_ref, m2_ref, sh2_ref, o_ref, *, do_h_upsample):
    """Fused UpBlock forward for a block of `bb` batch images, lane-flat layout.

    x1f_ref: (bb, Hin, Win*C1)   low-res decoder features, compute dtype
    x2f_ref: (bb, H,   W*C2)     skip connection, compute dtype
    k1w_ref: (Win*C1, W*C2)      conv1x1 folded with bilinear width-upsample
    b1w_ref: (1, W*C2)           conv1x1 bias through the width-upsample (f32)
    uh_ref:  (H, Hin)            bilinear height-upsample matrix (unused if Hin == H)
    m1_ref:  (3, 2*W*C2, W*Cout) merged stage-1 banded conv weights [x2-part | x1-part]
    sh1_ref: (1, W*Cout)         stage-1 shift = tile(beta + (bias - mean)*scale, W) (f32)
    m2_ref:  (3, W*Cout, W*Cout) stage-2 banded conv weights (BN scale folded)
    sh2_ref: (1, W*Cout)         stage-2 shift (f32)
    o_ref:   (bb, H, W*Cout)     output, lane-dense
    """
    f32 = jnp.float32
    cdt = m1_ref.dtype                       # MXU compute dtype (bf16 default, or f32)
    bb, H, w_cout = o_ref.shape
    w_c2 = x2f_ref.shape[2]
    Hp = H + 2
    M = bb * Hp - 2                          # stacked rows: bb*H valid + 2*(bb-1) junk rows

    # ---- x1 path (conv1x1 + upsample) and cat([x2, up(x1)]) as a lane concat, stacked ----
    zrow = jnp.zeros((1, 2 * w_c2), cdt)
    pieces = []
    for b in range(bb):                      # bb is small & static (<= B)
        x1h = x1f_ref[b]                     # (Hin, Win*C1), already compute dtype
        if do_h_upsample:                    # height-upsample first: no extra f32 round trip
            x1h = jnp.dot(uh_ref[...], x1h, preferred_element_type=f32).astype(cdt)
        t = jnp.dot(x1h, k1w_ref[...], preferred_element_type=f32) + b1w_ref[...]
        xin = jnp.concatenate([x2f_ref[b], t.astype(cdt)], axis=1)   # (H, 2*W*C2)
        pieces += [zrow, xin, zrow]          # per-image zero halo rows (conv pad=1 along H)
    xs = jnp.concatenate(pieces, axis=0)     # (bb*(H+2), 2*W*C2), compute dtype

    # ---- stage 1: Conv3x3 + BatchNorm + LeakyReLU (3 banded matmuls, K = 2*W*C2) ----
    acc = jnp.dot(xs[0:M], m1_ref[0], preferred_element_type=f32)
    acc = acc + jnp.dot(xs[1:M + 1], m1_ref[1], preferred_element_type=f32)
    acc = acc + jnp.dot(xs[2:M + 2], m1_ref[2], preferred_element_type=f32)
    y1 = acc + sh1_ref[...]                  # folded conv-bias + BN (eval running stats)
    y1 = jnp.where(y1 > 0, y1, 0.01 * y1)    # LeakyReLU (slope 0.01), f32 epilogue
    y1 = y1.astype(cdt)                      # single cast for stage 2
    # Dropout(p): identity in eval mode.
    # TODO(synk): training-mode dropout (pltpu.prng_random_bits mask + 1/(1-p) scaling).

    # ---- stage 2: Conv3x3 + BatchNorm + LeakyReLU ----
    zrow_o = jnp.zeros((1, w_cout), cdt)
    pieces2 = []
    for b in range(bb):                      # drop junk boundary rows, re-insert halo zeros
        pieces2 += [zrow_o, y1[b * Hp: b * Hp + H], zrow_o]
    ys = jnp.concatenate(pieces2, axis=0)    # (bb*(H+2), W*Cout)
    acc2 = jnp.dot(ys[0:M], m2_ref[0], preferred_element_type=f32)
    acc2 = acc2 + jnp.dot(ys[1:M + 1], m2_ref[1], preferred_element_type=f32)
    acc2 = acc2 + jnp.dot(ys[2:M + 2], m2_ref[2], preferred_element_type=f32)
    y2 = acc2 + sh2_ref[...]
    y2 = jnp.where(y2 > 0, y2, 0.01 * y2)

    for b in range(bb):                      # lane-dense stores (W*Cout lanes)
        o_ref[b] = y2[b * Hp: b * Hp + H].astype(o_ref.dtype)


# ----------------------------- host-side constant folding -----------------------------

def _upsample_matrix(n_in, n_out, mode):
    """(n_out, n_in) interpolation matrix matching torch.nn.Upsample(scale_factor=2)."""
    if n_in == n_out:
        return np.eye(n_out, dtype=np.float32)
    idx = np.arange(n_out)
    if mode == 2:                                            # nearest
        src = (idx * n_in) // n_out
        u = np.zeros((n_out, n_in), np.float32)
        u[idx, src] = 1.0
        return u
    if mode == 1:                                            # bilinear, align_corners=True
        if n_in == 1:
            return np.ones((n_out, 1), np.float32)
        src = idx.astype(np.float64) * (n_in - 1) / (n_out - 1)
        lo = np.clip(np.floor(src).astype(np.int64), 0, n_in - 2)
        frac = (src - lo).astype(np.float32)
        u = np.zeros((n_out, n_in), np.float32)
        u[idx, lo] += 1.0 - frac
        u[idx, lo + 1] += frac
        return u
    # TODO(synk): mode 0 (ConvTranspose2d) and mode 3 (bicubic, align_corners=True).
    raise NotImplementedError(f"mode_upsampling={mode} not implemented")


def _conv3x3_band_matrices(w_oihw, scale, width):
    """Per-dy banded matrices (3, width*Cin, width*Cout) that apply a 3x3 conv
    (stride 1, zero pad 1 along W) with the BN scale folded in, in the lane-flat
    (H, W*C) layout:   out[h] = sum_dy  xpad_rows[h+dy] @ M[dy]."""
    cin, cout = w_oihw.shape[1], w_oihw.shape[0]
    wf = w_oihw * scale[:, None, None, None]               # fold gamma / sqrt(var + eps)
    k = jnp.transpose(wf, (2, 3, 1, 0))                    # (dy, dx, Cin, Cout)
    wi = jnp.arange(width)[:, None]
    wo = jnp.arange(width)[None, :]
    dx = wi - wo + 1                                        # tap; outside [0,2] => zero (W pad)
    valid = ((dx >= 0) & (dx <= 2)).astype(wf.dtype)
    m = k[:, jnp.clip(dx, 0, 2)] * valid[None, :, :, None, None]   # (3, W, W, Cin, Cout)
    m = jnp.transpose(m, (0, 1, 3, 2, 4))                   # (3, W_in, Cin, W_out, Cout)
    return m.reshape(3, width * cin, width * cout)


# ----------------------------- public wrappers -----------------------------

def upblock_forward_nhwc(x1, x2, params, dropout_p=0.0, mode_upsampling=1,
                         compute_dtype=jnp.bfloat16, batch_block=None, eps=1e-5):
    """UpBlock forward (eval semantics), NHWC in / NHWC out, one fused pallas_call.

    compute_dtype: dtype fed to the MXU (bf16 default — recommended on v6e/v7x); accumulation
    and the BN/LeakyReLU epilogue stay f32.  batch_block=None -> whole batch in one grid step
    (best on 1-TC v5e/v6e); batch_block=1 -> grid=(B,) "parallel" for v7x 2-TC sharding.
    dropout_p is identity in eval.
    """
    if mode_upsampling == 0:
        # TODO(synk): mode 0 uses ConvTranspose2d instead of conv1x1 + upsample.
        raise NotImplementedError("mode_upsampling=0 (ConvTranspose2d) not implemented")
    B, h_in, w_in, c1 = x1.shape
    _, H, W, c2 = x2.shape
    c_out = params["w1"].shape[0]
    bb = B if batch_block is None else int(batch_block)
    assert B % bb == 0, (B, bb)

    # Fold conv bias + BatchNorm (eval running stats) into per-channel scale & shift.
    s1 = params["g1"] / jnp.sqrt(params["rv1"] + eps)
    sh1 = params["be1"] + (params["b1"] - params["rm1"]) * s1
    s2 = params["g2"] / jnp.sqrt(params["rv2"] + eps)
    sh2 = params["be2"] + (params["b2"] - params["rm2"]) * s2

    # Upsample matrices (numpy: static compile-time constants).  The conv1x1-bias folding
    # below requires unit row-sums (true for identity / nearest / bilinear align_corners).
    uh = _upsample_matrix(h_in, H, mode_upsampling)          # (H, Hin)
    uw = _upsample_matrix(w_in, W, mode_upsampling)          # (W, Win)
    assert np.allclose(uh.sum(axis=1), 1.0, atol=1e-5), "bias folding needs unit row sums"
    assert np.allclose(uw.sum(axis=1), 1.0, atol=1e-5), "bias folding needs unit row sums"

    wp = jnp.transpose(params["w1x1"][:, :, 0, 0])           # (C1, C2)
    k1w = jnp.kron(jnp.asarray(uw.T), wp)                    # (Win*C1, W*C2)
    b1w = (jnp.asarray(uw.sum(axis=1))[:, None] * params["b1x1"][None, :]).reshape(1, W * c2)

    # Merged stage-1 banded weights: K axis = [x2 lanes | up(x1) lanes], matching the
    # in-kernel lane concat (realizes cat([x2, x1], dim=1) without materializing it).
    m1 = jnp.concatenate(
        [_conv3x3_band_matrices(params["w1"][:, :c2], s1, W),
         _conv3x3_band_matrices(params["w1"][:, c2:], s1, W)], axis=1)  # (3, 2*W*C2, W*Cout)
    m2 = _conv3x3_band_matrices(params["w2"], s2, W)                    # (3, W*Cout, W*Cout)
    sh1_row = jnp.tile(sh1, W).reshape(1, W * c_out)
    sh2_row = jnp.tile(sh2, W).reshape(1, W * c_out)

    cdt = compute_dtype
    x1f = x1.reshape(B, h_in, w_in * c1).astype(cdt)          # lane-flat inputs
    x2f = x2.reshape(B, H, W * c2).astype(cdt)

    # Size scoped VMEM from the actual (double-buffered) block bytes rather than a flat cap.
    isz = jnp.dtype(cdt).itemsize
    block_bytes = (bb * h_in * w_in * c1 * isz + bb * H * W * c2 * isz
                   + w_in * c1 * W * c2 * isz + W * c2 * 4 + H * h_in * isz
                   + 3 * (2 * W * c2) * (W * c_out) * isz + W * c_out * 4
                   + 3 * (W * c_out) * (W * c_out) * isz + W * c_out * 4
                   + bb * H * W * c_out * jnp.dtype(x2.dtype).itemsize)
    vmem_limit = int(min(64 << 20, max(4 << 20, 4 * block_bytes)))

    kernel = functools.partial(upblock_kernel, do_h_upsample=(h_in != H))
    out_flat = pl.pallas_call(
        kernel,
        out_shape=jax.ShapeDtypeStruct((B, H, W * c_out), x2.dtype),
        grid=(B // bb,),
        in_specs=[
            pl.BlockSpec((bb, h_in, w_in * c1), lambda g: (g, 0, 0)),
            pl.BlockSpec((bb, H, W * c2), lambda g: (g, 0, 0)),
            # grid-invariant operands (small: BN scale/shift already folded into them)
            pl.BlockSpec((w_in * c1, W * c2), lambda g: (0, 0)),
            pl.BlockSpec((1, W * c2), lambda g: (0, 0)),
            pl.BlockSpec((H, h_in), lambda g: (0, 0)),
            pl.BlockSpec((3, 2 * W * c2, W * c_out), lambda g: (0, 0, 0)),
            pl.BlockSpec((1, W * c_out), lambda g: (0, 0)),
            pl.BlockSpec((3, W * c_out, W * c_out), lambda g: (0, 0, 0)),
            pl.BlockSpec((1, W * c_out), lambda g: (0, 0)),
        ],
        out_specs=pl.BlockSpec((bb, H, W * c_out), lambda g: (g, 0, 0)),
        compiler_params=pltpu.CompilerParams(
            dimension_semantics=("parallel",),     # megacore / v7x 2-TC sharding over batch
            vmem_limit_bytes=vmem_limit,
        ),
    )(x1f, x2f, k1w.astype(cdt), b1w.astype(jnp.float32), jnp.asarray(uh, dtype=cdt),
      m1.astype(cdt), sh1_row.astype(jnp.float32), m2.astype(cdt),
      sh2_row.astype(jnp.float32))

    return out_flat.reshape(B, H, W, c_out)


def upblock_forward(x1_nchw, x2_nchw, params, dropout_p=0.0, mode_upsampling=1,
                    compute_dtype=jnp.bfloat16, batch_block=None):
    """PyTorch-parity adapter: NCHW in / NCHW out (one transpose per tensor per UpBlock)."""
    x1 = jnp.transpose(x1_nchw, (0, 2, 3, 1))
    x2 = jnp.transpose(x2_nchw, (0, 2, 3, 1))
    out = upblock_forward_nhwc(x1, x2, params, dropout_p, mode_upsampling,
                               compute_dtype, batch_block)
    return jnp.transpose(out, (0, 3, 1, 2))


# ----------------------------- parameter init -----------------------------

def init_upblock_params(key, in_channels1, in_channels2, out_channels):
    """Deterministic parameters matching UpBlock.__init__ shapes (mode_upsampling != 0).
    BatchNorm stats/affine are randomized so the scale/shift folding is actually tested."""
    ks = jax.random.split(key, 14)
    cin_cb = 2 * in_channels2

    def uni(k, shape, fan_in):
        bound = 1.0 / float(fan_in) ** 0.5
        return jax.random.uniform(k, shape, jnp.float32, -bound, bound)

    return {
        # Conv2d(in_channels1, in_channels2, kernel_size=1)
        "w1x1": uni(ks[0], (in_channels2, in_channels1, 1, 1), in_channels1),
        "b1x1": uni(ks[1], (in_channels2,), in_channels1),
        # ConvBlock: Conv2d(2*in_channels2, out_channels, 3, padding=1) + BatchNorm2d
        "w1": uni(ks[2], (out_channels, cin_cb, 3, 3), cin_cb * 9),
        "b1": uni(ks[3], (out_channels,), cin_cb * 9),
        "g1": 0.5 + jax.random.uniform(ks[4], (out_channels,), jnp.float32),
        "be1": 0.1 * jax.random.normal(ks[5], (out_channels,), jnp.float32),
        "rm1": 0.1 * jax.random.normal(ks[6], (out_channels,), jnp.float32),
        "rv1": 0.5 + jax.random.uniform(ks[7], (out_channels,), jnp.float32),
        # Conv2d(out_channels, out_channels, 3, padding=1) + BatchNorm2d
        "w2": uni(ks[8], (out_channels, out_channels, 3, 3), out_channels * 9),
        "b2": uni(ks[9], (out_channels,), out_channels * 9),
        "g2": 0.5 + jax.random.uniform(ks[10], (out_channels,), jnp.float32),
        "be2": 0.1 * jax.random.normal(ks[11], (out_channels,), jnp.float32),
        "rm2": 0.1 * jax.random.normal(ks[12], (out_channels,), jnp.float32),
        "rv2": 0.5 + jax.random.uniform(ks[13], (out_channels,), jnp.float32),
    }


# ----------------------------- pure-JAX reference -----------------------------

def _ref_conv3x3_bn_lrelu(x, w, b, gamma, beta, rmean, rvar, eps=1e-5):
    y = lax.conv_general_dilated(x, w, (1, 1), ((1, 1), (1, 1)),
                                 dimension_numbers=("NCHW", "OIHW", "NCHW"),
                                 precision=lax.Precision.HIGHEST)
    y = y + b.reshape(1, -1, 1, 1)
    y = (y - rmean.reshape(1, -1, 1, 1)) / jnp.sqrt(rvar.reshape(1, -1, 1, 1) + eps)
    y = y * gamma.reshape(1, -1, 1, 1) + beta.reshape(1, -1, 1, 1)
    return jnp.where(y > 0, y, 0.01 * y)


def upblock_reference(x1_nchw, x2_nchw, p, mode_upsampling=1):
    """Pure-JAX reference of UpBlock.forward (eval semantics), NCHW like PyTorch."""
    y = lax.conv_general_dilated(x1_nchw, p["w1x1"], (1, 1), ((0, 0), (0, 0)),
                                 dimension_numbers=("NCHW", "OIHW", "NCHW"),
                                 precision=lax.Precision.HIGHEST)
    y = y + p["b1x1"].reshape(1, -1, 1, 1)
    if x1_nchw.shape[-2:] != x2_nchw.shape[-2:]:
        uh = jnp.asarray(_upsample_matrix(x1_nchw.shape[-2], x2_nchw.shape[-2], mode_upsampling))
        uw = jnp.asarray(_upsample_matrix(x1_nchw.shape[-1], x2_nchw.shape[-1], mode_upsampling))
        y = jnp.einsum("hH,wW,bcHW->bchw", uh, uw, y, precision=lax.Precision.HIGHEST)
    x = jnp.concatenate([x2_nchw, y], axis=1)
    x = _ref_conv3x3_bn_lrelu(x, p["w1"], p["b1"], p["g1"], p["be1"], p["rm1"], p["rv1"])
    x = _ref_conv3x3_bn_lrelu(x, p["w2"], p["b2"], p["g2"], p["be2"], p["rm2"], p["rv2"])
    return x


# ----------------------------- demo / self-check -----------------------------

if __name__ == "__main__":
    key = jax.random.PRNGKey(0)
    kx1, kx2, kp = jax.random.split(key, 3)

    # Small UpBlock-consistent shapes: decoder features x1 at half resolution, skip x2 full.
    B, C1, C2, COUT = 2, 8, 4, 8
    H = W = 16
    HIN = WIN = 8
    DROPOUT_P = 0.1
    MODE = 1                        # bilinear, align_corners=True (module default)

    x1 = jax.random.normal(kx1, (B, C1, HIN, WIN), jnp.float32)    # NCHW, like PyTorch
    x2 = jax.random.normal(kx2, (B, C2, H, W), jnp.float32)
    params = init_upblock_params(kp, C1, C2, COUT)

    ref = jax.block_until_ready(upblock_reference(x1, x2, params, MODE))

    # f32 MXU path, whole batch in one grid step (tight check)
    out = jax.block_until_ready(
        upblock_forward(x1, x2, params, DROPOUT_P, MODE, compute_dtype=jnp.float32))
    assert out.shape == (B, COUT, H, W), out.shape
    err = float(jnp.max(jnp.abs(out - ref)))
    assert jnp.allclose(out, ref, atol=2e-3, rtol=2e-3), err

    # bf16 MXU path (default; recommended on v6e/v7x): f32 accumulation + f32 epilogue
    out_bf16 = jax.block_until_ready(upblock_forward(x1, x2, params, DROPOUT_P, MODE))
    err_bf16 = float(jnp.max(jnp.abs(out_bf16 - ref)))
    assert jnp.allclose(out_bf16, ref, atol=6e-2, rtol=6e-2), err_bf16

    # batch_block=1 path: grid=(B,) with the batch axis "parallel" (v7x 2-TC sharding)
    out_pb = jax.block_until_ready(
        upblock_forward(x1, x2, params, DROPOUT_P, MODE, batch_block=1))
    err_pb = float(jnp.max(jnp.abs(out_pb - ref)))
    assert jnp.allclose(out_pb, ref, atol=6e-2, rtol=6e-2), err_pb

    print("KERNEL_OK")
</pallas_src>

<mosaic_0001>
module attributes {stable_mosaic.version = 11 : i64} {
  func.func @upblock_kernel(%arg0: i32, %arg1: memref<2x8x64xf32, #tpu.memory_space<vmem>>, %arg2: memref<2x16x64xf32, #tpu.memory_space<vmem>>, %arg3: memref<64x64xf32, #tpu.memory_space<vmem>>, %arg4: memref<1x64xf32, #tpu.memory_space<vmem>>, %arg5: memref<16x8xf32, #tpu.memory_space<vmem>>, %arg6: memref<3x128x128xf32, #tpu.memory_space<vmem>>, %arg7: memref<1x128xf32, #tpu.memory_space<vmem>>, %arg8: memref<3x128x128xf32, #tpu.memory_space<vmem>>, %arg9: memref<1x128xf32, #tpu.memory_space<vmem>>, %arg10: memref<2x16x128xf32, #tpu.memory_space<vmem>>) attributes {dimension_semantics = [#tpu.dimension_semantics<parallel>], iteration_bounds = array<i64: 1>, scalar_prefetch = 0 : i64, scratch_operands = 0 : i64, tpu.core_type = #tpu.core_type<tc>, window_params = [{transform_indices = @transform_0, window_bounds = array<i64: 2, 8, 64>}, {transform_indices = @transform_1, window_bounds = array<i64: 2, 16, 64>}, {pipeline_mode = #tpu.pipeline_mode<synchronous>, transform_indices = @transform_2, window_bounds = array<i64: 64, 64>}, {pipeline_mode = #tpu.pipeline_mode<synchronous>, transform_indices = @transform_3, window_bounds = array<i64: 1, 64>}, {pipeline_mode = #tpu.pipeline_mode<synchronous>, transform_indices = @transform_4, window_bounds = array<i64: 16, 8>}, {pipeline_mode = #tpu.pipeline_mode<synchronous>, transform_indices = @transform_5, window_bounds = array<i64: 3, 128, 128>}, {pipeline_mode = #tpu.pipeline_mode<synchronous>, transform_indices = @transform_6, window_bounds = array<i64: 1, 128>}, {pipeline_mode = #tpu.pipeline_mode<synchronous>, transform_indices = @transform_7, window_bounds = array<i64: 3, 128, 128>}, {pipeline_mode = #tpu.pipeline_mode<synchronous>, transform_indices = @transform_8, window_bounds = array<i64: 1, 128>}, {transform_indices = @transform_9, window_bounds = array<i64: 2, 16, 128>}]} {
    %cst = arith.constant 0.000000e+00 : f32
    %0 = vector.broadcast %cst : f32 to vector<1x128xf32>
    %c0 = arith.constant 0 : index
    %c0_0 = arith.constant 0 : index
    %c0_1 = arith.constant 0 : index
    %1 = vector.load %arg1[%c0, %c0_0, %c0_1] : memref<2x8x64xf32, #tpu.memory_space<vmem>>, vector<1x8x64xf32>
    %2 = vector.shape_cast %1 : vector<1x8x64xf32> to vector<8x64xf32>
    %c0_2 = arith.constant 0 : index
    %c0_3 = arith.constant 0 : index
    %3 = vector.load %arg5[%c0_2, %c0_3] : memref<16x8xf32, #tpu.memory_space<vmem>>, vector<16x8xf32>
    %cst_4 = arith.constant dense<0.000000e+00> : vector<16x64xf32>
    %4 = tpu.matmul %3, %2, %cst_4 {dimension_numbers = #tpu.dot_dimension_numbers<[1], [0], [0], [1], [0, 0, 1, 1], [], []>} : vector<16x8xf32>, vector<8x64xf32>, vector<16x64xf32> -> vector<16x64xf32>
    %c0_5 = arith.constant 0 : index
    %c0_6 = arith.constant 0 : index
    %5 = vector.load %arg3[%c0_5, %c0_6] : memref<64x64xf32, #tpu.memory_space<vmem>>, vector<64x64xf32>
    %cst_7 = arith.constant dense<0.000000e+00> : vector<16x64xf32>
    %6 = tpu.matmul %4, %5, %cst_7 {dimension_numbers = #tpu.dot_dimension_numbers<[1], [0], [0], [1], [0, 0, 1, 1], [], []>} : vector<16x64xf32>, vector<64x64xf32>, vector<16x64xf32> -> vector<16x64xf32>
    %c0_8 = arith.constant 0 : index
    %c0_9 = arith.constant 0 : index
    %7 = vector.load %arg4[%c0_8, %c0_9] : memref<1x64xf32, #tpu.memory_space<vmem>>, vector<1x64xf32>
    %8 = vector.broadcast %7 : vector<1x64xf32> to vector<16x64xf32>
    %9 = arith.addf %6, %8 : vector<16x64xf32>
    %c0_10 = arith.constant 0 : index
    %c0_11 = arith.constant 0 : index
    %c0_12 = arith.constant 0 : index
    %10 = vector.load %arg2[%c0_10, %c0_11, %c0_12] : memref<2x16x64xf32, #tpu.memory_space<vmem>>, vector<1x16x64xf32>
    %11 = vector.shape_cast %10 : vector<1x16x64xf32> to vector<16x64xf32>
    %12 = tpu.concatenate %11, %9 in 1 : vector<16x64xf32>, vector<16x64xf32> -> vector<16x128xf32>
    %c1 = arith.constant 1 : index
    %c0_13 = arith.constant 0 : index
    %c0_14 = arith.constant 0 : index
    %13 = vector.load %arg1[%c1, %c0_13, %c0_14] : memref<2x8x64xf32, #tpu.memory_space<vmem>>, vector<1x8x64xf32>
    %14 = vector.shape_cast %13 : vector<1x8x64xf32> to vector<8x64xf32>
    %c0_15 = arith.constant 0 : index
    %c0_16 = arith.constant 0 : index
    %15 = vector.load %arg5[%c0_15, %c0_16] : memref<16x8xf32, #tpu.memory_space<vmem>>, vector<16x8xf32>
    %cst_17 = arith.constant dense<0.000000e+00> : vector<16x64xf32>
    %16 = tpu.matmul %15, %14, %cst_17 {dimension_numbers = #tpu.dot_dimension_numbers<[1], [0], [0], [1], [0, 0, 1, 1], [], []>} : vector<16x8xf32>, vector<8x64xf32>, vector<16x64xf32> -> vector<16x64xf32>
    %c0_18 = arith.constant 0 : index
    %c0_19 = arith.constant 0 : index
    %17 = vector.load %arg3[%c0_18, %c0_19] : memref<64x64xf32, #tpu.memory_space<vmem>>, vector<64x64xf32>
    %cst_20 = arith.constant dense<0.000000e+00> : vector<16x64xf32>
    %18 = tpu.matmul %16, %17, %cst_20 {dimension_numbers = #tpu.dot_dimension_numbers<[1], [0], [0], [1], [0, 0, 1, 1], [], []>} : vector<16x64xf32>, vector<64x64xf32>, vector<16x64xf32> -> vector<16x64xf32>
    %c0_21 = arith.constant 0 : index
    %c0_22 = arith.constant 0 : index
    %19 = vector.load %arg4[%c0_21, %c0_22] : memref<1x64xf32, #tpu.memory_space<vmem>>, vector<1x64xf32>
    %20 = vector.broadcast %19 : vector<1x64xf32> to vector<16x64xf32>
    %21 = arith.addf %18, %20 : vector<16x64xf32>
    %c1_23 = arith.constant 1 : index
    %c0_24 = arith.constant 0 : index
    %c0_25 = arith.constant 0 : index
    %22 = vector.load %arg2[%c1_23, %c0_24, %c0_25] : memref<2x16x64xf32, #tpu.memory_space<vmem>>, vector<1x16x64xf32>
    %23 = vector.shape_cast %22 : vector<1x16x64xf32> to vector<16x64xf32>
    %24 = tpu.concatenate %23, %21 in 1 : vector<16x64xf32>, vector<16x64xf32> -> vector<16x128xf32>
    %25 = tpu.concatenate %0, %12, %0, %0, %24, %0 in 0 : vector<1x128xf32>, vector<16x128xf32>, vector<1x128xf32>, vector<1x128xf32>, vector<16x128xf32>, vector<1x128xf32> -> vector<36x128xf32>
    %26 = vector.extract_strided_slice %25 {offsets = [0, 0], sizes = [34, 128], strides = [1, 1]} : vector<36x128xf32> to vector<34x128xf32>
    %c0_26 = arith.constant 0 : index
    %c0_27 = arith.constant 0 : index
    %c0_28 = arith.constant 0 : index
    %27 = vector.load %arg6[%c0_26, %c0_27, %c0_28] : memref<3x128x128xf32, #tpu.memory_space<vmem>>, vector<1x128x128xf32>
    %28 = vector.shape_cast %27 : vector<1x128x128xf32> to vector<128x128xf32>
    %cst_29 = arith.constant dense<0.000000e+00> : vector<34x128xf32>
    %29 = tpu.matmul %26, %28, %cst_29 {dimension_numbers = #tpu.dot_dimension_numbers<[1], [0], [0], [1], [0, 0, 1, 1], [], []>} : vector<34x128xf32>, vector<128x128xf32>, vector<34x128xf32> -> vector<34x128xf32>
    %30 = vector.extract_strided_slice %25 {offsets = [1, 0], sizes = [34, 128], strides = [1, 1]} : vector<36x128xf32> to vector<34x128xf32>
    %c1_30 = arith.constant 1 : index
    %c0_31 = arith.constant 0 : index
    %c0_32 = arith.constant 0 : index
    %31 = vector.load %arg6[%c1_30, %c0_31, %c0_32] : memref<3x128x128xf32, #tpu.memory_space<vmem>>, vector<1x128x128xf32>
    %32 = vector.shape_cast %31 : vector<1x128x128xf32> to vector<128x128xf32>
    %cst_33 = arith.constant dense<0.000000e+00> : vector<34x128xf32>
    %33 = tpu.matmul %30, %32, %cst_33 {dimension_numbers = #tpu.dot_dimension_numbers<[1], [0], [0], [1], [0, 0, 1, 1], [], []>} : vector<34x128xf32>, vector<128x128xf32>, vector<34x128xf32> -> vector<34x128xf32>
    %34 = arith.addf %29, %33 : vector<34x128xf32>
    %35 = vector.extract_strided_slice %25 {offsets = [2, 0], sizes = [34, 128], strides = [1, 1]} : vector<36x128xf32> to vector<34x128xf32>
    %c2 = arith.constant 2 : index
    %c0_34 = arith.constant 0 : index
    %c0_35 = arith.constant 0 : index
    %36 = vector.load %arg6[%c2, %c0_34, %c0_35] : memref<3x128x128xf32, #tpu.memory_space<vmem>>, vector<1x128x128xf32>
    %37 = vector.shape_cast %36 : vector<1x128x128xf32> to vector<128x128xf32>
    %cst_36 = arith.constant dense<0.000000e+00> : vector<34x128xf32>
    %38 = tpu.matmul %35, %37, %cst_36 {dimension_numbers = #tpu.dot_dimension_numbers<[1], [0], [0], [1], [0, 0, 1, 1], [], []>} : vector<34x128xf32>, vector<128x128xf32>, vector<34x128xf32> -> vector<34x128xf32>
    %39 = arith.addf %34, %38 : vector<34x128xf32>
    %c0_37 = arith.constant 0 : index
    %c0_38 = arith.constant 0 : index
    %40 = vector.load %arg7[%c0_37, %c0_38] : memref<1x128xf32, #tpu.memory_space<vmem>>, vector<1x128xf32>
    %41 = vector.broadcast %40 : vector<1x128xf32> to vector<34x128xf32>
    %42 = arith.addf %39, %41 : vector<34x128xf32>
    %cst_39 = arith.constant 0.000000e+00 : f32
    %43 = vector.broadcast %cst_39 : f32 to vector<34x128xf32>
    %44 = arith.cmpf ogt, %42, %43 : vector<34x128xf32>
    %cst_40 = arith.constant 0.00999999977 : f32
    %45 = vector.broadcast %cst_40 : f32 to vector<34x128xf32>
    %46 = arith.mulf %45, %42 : vector<34x128xf32>
    %47 = arith.select %44, %42, %46 : vector<34x128xi1>, vector<34x128xf32>
    %cst_41 = arith.constant 0.000000e+00 : f32
    %48 = vector.broadcast %cst_41 : f32 to vector<1x128xf32>
    %49 = vector.extract_strided_slice %47 {offsets = [0, 0], sizes = [16, 128], strides = [1, 1]} : vector<34x128xf32> to vector<16x128xf32>
    %50 = vector.extract_strided_slice %47 {offsets = [18, 0], sizes = [16, 128], strides = [1, 1]} : vector<34x128xf32> to vector<16x128xf32>
    %51 = tpu.concatenate %48, %49, %48, %48, %50, %48 in 0 : vector<1x128xf32>, vector<16x128xf32>, vector<1x128xf32>, vector<1x128xf32>, vector<16x128xf32>, vector<1x128xf32> -> vector<36x128xf32>
    %52 = vector.extract_strided_slice %51 {offsets = [0, 0], sizes = [34, 128], strides = [1, 1]} : vector<36x128xf32> to vector<34x128xf32>
    %c0_42 = arith.constant 0 : index
    %c0_43 = arith.constant 0 : index
    %c0_44 = arith.constant 0 : index
    %53 = vector.load %arg8[%c0_42, %c0_43, %c0_44] : memref<3x128x128xf32, #tpu.memory_space<vmem>>, vector<1x128x128xf32>
    %54 = vector.shape_cast %53 : vector<1x128x128xf32> to vector<128x128xf32>
    %cst_45 = arith.constant dense<0.000000e+00> : vector<34x128xf32>
    %55 = tpu.matmul %52, %54, %cst_45 {dimension_numbers = #tpu.dot_dimension_numbers<[1], [0], [0], [1], [0, 0, 1, 1], [], []>} : vector<34x128xf32>, vector<128x128xf32>, vector<34x128xf32> -> vector<34x128xf32>
    %56 = vector.extract_strided_slice %51 {offsets = [1, 0], sizes = [34, 128], strides = [1, 1]} : vector<36x128xf32> to vector<34x128xf32>
    %c1_46 = arith.constant 1 : index
    %c0_47 = arith.constant 0 : index
    %c0_48 = arith.constant 0 : index
    %57 = vector.load %arg8[%c1_46, %c0_47, %c0_48] : memref<3x128x128xf32, #tpu.memory_space<vmem>>, vector<1x128x128xf32>
    %58 = vector.shape_cast %57 : vector<1x128x128xf32> to vector<128x128xf32>
    %cst_49 = arith.constant dense<0.000000e+00> : vector<34x128xf32>
    %59 = tpu.matmul %56, %58, %cst_49 {dimension_numbers = #tpu.dot_dimension_numbers<[1], [0], [0], [1], [0, 0, 1, 1], [], []>} : vector<34x128xf32>, vector<128x128xf32>, vector<34x128xf32> -> vector<34x128xf32>
    %60 = arith.addf %55, %59 : vector<34x128xf32>
    %61 = vector.extract_strided_slice %51 {offsets = [2, 0], sizes = [34, 128], strides = [1, 1]} : vector<36x128xf32> to vector<34x128xf32>
    %c2_50 = arith.constant 2 : index
    %c0_51 = arith.constant 0 : index
    %c0_52 = arith.constant 0 : index
    %62 = vector.load %arg8[%c2_50, %c0_51, %c0_52] : memref<3x128x128xf32, #tpu.memory_space<vmem>>, vector<1x128x128xf32>
    %63 = vector.shape_cast %62 : vector<1x128x128xf32> to vector<128x128xf32>
    %cst_53 = arith.constant dense<0.000000e+00> : vector<34x128xf32>
    %64 = tpu.matmul %61, %63, %cst_53 {dimension_numbers = #tpu.dot_dimension_numbers<[1], [0], [0], [1], [0, 0, 1, 1], [], []>} : vector<34x128xf32>, vector<128x128xf32>, vector<34x128xf32> -> vector<34x128xf32>
    %65 = arith.addf %60, %64 : vector<34x128xf32>
    %c0_54 = arith.constant 0 : index
    %c0_55 = arith.constant 0 : index
    %66 = vector.load %arg9[%c0_54, %c0_55] : memref<1x128xf32, #tpu.memory_space<vmem>>, vector<1x128xf32>
    %67 = vector.broadcast %66 : vector<1x128xf32> to vector<34x128xf32>
    %68 = arith.addf %65, %67 : vector<34x128xf32>
    %cst_56 = arith.constant 0.000000e+00 : f32
    %69 = vector.broadcast %cst_56 : f32 to vector<34x128xf32>
    %70 = arith.cmpf ogt, %68, %69 : vector<34x128xf32>
    %cst_57 = arith.constant 0.00999999977 : f32
    %71 = vector.broadcast %cst_57 : f32 to vector<34x128xf32>
    %72 = arith.mulf %71, %68 : vector<34x128xf32>
    %73 = arith.select %70, %68, %72 : vector<34x128xi1>, vector<34x128xf32>
    %74 = vector.extract_strided_slice %73 {offsets = [0, 0], sizes = [16, 128], strides = [1, 1]} : vector<34x128xf32> to vector<16x128xf32>
    %c0_58 = arith.constant 0 : index
    %c0_59 = arith.constant 0 : index
    %c0_60 = arith.constant 0 : index
    %75 = vector.load %arg10[%c0_58, %c0_59, %c0_60] : memref<2x16x128xf32, #tpu.memory_space<vmem>>, vector<1x16x128xf32>
    %76 = vector.shape_cast %75 : vector<1x16x128xf32> to vector<16x128xf32>
    %77 = vector.shape_cast %74 : vector<16x128xf32> to vector<1x16x128xf32>
    tpu.vector_store %arg10[%c0_58, %c0_59, %c0_60], %77 {strides = array<i32>} : memref<2x16x128xf32, #tpu.memory_space<vmem>>, vector<1x16x128xf32>,
    %78 = vector.extract_strided_slice %73 {offsets = [18, 0], sizes = [16, 128], strides = [1, 1]} : vector<34x128xf32> to vector<16x128xf32>
    %c1_61 = arith.constant 1 : index
    %c0_62 = arith.constant 0 : index
    %c0_63 = arith.constant 0 : index
    %79 = vector.load %arg10[%c1_61, %c0_62, %c0_63] : memref<2x16x128xf32, #tpu.memory_space<vmem>>, vector<1x16x128xf32>
    %80 = vector.shape_cast %79 : vector<1x16x128xf32> to vector<16x128xf32>
    %81 = vector.shape_cast %78 : vector<16x128xf32> to vector<1x16x128xf32>
    tpu.vector_store %arg10[%c1_61, %c0_62, %c0_63], %81 {strides = array<i32>} : memref<2x16x128xf32, #tpu.memory_space<vmem>>, vector<1x16x128xf32>,
    return
  }
  func.func @transform_0(%arg0: i32) -> (i32, i32, i32) {
    %c0_i32 = arith.constant 0 : i32
    %c0_i32_0 = arith.constant 0 : i32
    %c0_i32_1 = arith.constant 0 : i32
    return %arg0, %c0_i32, %c0_i32_0 : i32, i32, i32
  }
  func.func @transform_1(%arg0: i32) -> (i32, i32, i32) {
    %c0_i32 = arith.constant 0 : i32
    %c0_i32_0 = arith.constant 0 : i32
    %c0_i32_1 = arith.constant 0 : i32
    return %arg0, %c0_i32, %c0_i32_0 : i32, i32, i32
  }
  func.func @transform_2(%arg0: i32) -> (i32, i32) {
    %c0_i32 = arith.constant 0 : i32
    %c0_i32_0 = arith.constant 0 : i32
    %c0_i32_1 = arith.constant 0 : i32
    return %c0_i32, %c0_i32_0 : i32, i32
  }
  func.func @transform_3(%arg0: i32) -> (i32, i32) {
    %c0_i32 = arith.constant 0 : i32
    %c0_i32_0 = arith.constant 0 : i32
    %c0_i32_1 = arith.constant 0 : i32
    return %c0_i32, %c0_i32_0 : i32, i32
  }
  func.func @transform_4(%arg0: i32) -> (i32, i32) {
    %c0_i32 = arith.constant 0 : i32
    %c0_i32_0 = arith.constant 0 : i32
    %c0_i32_1 = arith.constant 0 : i32
    return %c0_i32, %c0_i32_0 : i32, i32
  }
  func.func @transform_5(%arg0: i32) -> (i32, i32, i32) {
    %c0_i32 = arith.constant 0 : i32
    %c0_i32_0 = arith.constant 0 : i32
    %c0_i32_1 = arith.constant 0 : i32
    %c0_i32_2 = arith.constant 0 : i32
    return %c0_i32, %c0_i32_0, %c0_i32_1 : i32, i32, i32
  }
  func.func @transform_6(%arg0: i32) -> (i32, i32) {
    %c0_i32 = arith.constant 0 : i32
    %c0_i32_0 = arith.constant 0 : i32
    %c0_i32_1 = arith.constant 0 : i32
    return %c0_i32, %c0_i32_0 : i32, i32
  }
  func.func @transform_7(%arg0: i32) -> (i32, i32, i32) {
    %c0_i32 = arith.constant 0 : i32
    %c0_i32_0 = arith.constant 0 : i32
    %c0_i32_1 = arith.constant 0 : i32
    %c0_i32_2 = arith.constant 0 : i32
    return %c0_i32, %c0_i32_0, %c0_i32_1 : i32, i32, i32
  }
  func.func @transform_8(%arg0: i32) -> (i32, i32) {
    %c0_i32 = arith.constant 0 : i32
    %c0_i32_0 = arith.constant 0 : i32
    %c0_i32_1 = arith.constant 0 : i32
    return %c0_i32, %c0_i32_0 : i32, i32
  }
  func.func @transform_9(%arg0: i32) -> (i32, i32, i32) {
    %c0_i32 = arith.constant 0 : i32
    %c0_i32_0 = arith.constant 0 : i32
    %c0_i32_1 = arith.constant 0 : i32
    return %arg0, %c0_i32, %c0_i32_0 : i32, i32, i32
  }
}

</mosaic_0001>

<bundles_post_ra>
// kernel: tpu_custom_call.1
= control target key start
LH: loop header
LB: loop body
LE: loop exit
PB: predicated region body
PF: predicated region fallthrough
CT: control target
= control target key end

     0   :  { %14 = vsyncpa [#allocation3], 0  ;;  %s2458_s0 = inlined_call_operand.vmem [shape: f32[2,8,64], index: 0, kind: input, shape index: {}]   ;;  %s2459_s1 = inlined_call_operand.hbm [shape: f32[2,16,64], index: 1, kind: input, shape index: {}]   ;;  %s2460_s2 = inlined_call_operand.hbm [shape: f32[64,64], index: 2, kind: input, shape index: {}]   ;;  %s2461_s3 = inlined_call_operand.vmem [shape: f32[1,64], index: 3, kind: input, shape index: {}]   ;;  %s2462_s4 = inlined_call_operand.vmem [shape: f32[16,8], index: 4, kind: input, shape index: {}]   ;;  %s2463_s5 = inlined_call_operand.hbm [shape: f32[3,128,128], index: 5, kind: input, shape index: {}]   ;;  %s2464_s6 = inlined_call_operand.vmem [shape: f32[1,128], index: 6, kind: input, shape index: {}]   ;;  %s2465_s7 = inlined_call_operand.hbm [shape: f32[3,128,128], index: 7, kind: input, shape index: {}]   ;;  %s2466_s8 = inlined_call_operand.vmem [shape: f32[1,128], index: 8, kind: input, shape index: {}]   ;;  %s2467_s9 = inlined_call_operand.hbm [shape: f32[2,16,128], index: 9, kind: output, shape index: {}]  }
   0x1   :  { %15 = vsyncpa [#allocation6], 0 }
   0x2   :  { %16 = vsyncpa [#allocation9], 0 }
   0x3   :  { %17 = vsyncpa [#allocation4], 0  ;;  %s2099_s30 = smov [#allocation5]   ;;  %s2100_s11 = smov [#allocation2]  }
   0x4   :  { %s37_s10 = sshll.u32 %s2099_s30, 4  ;;  %s25_s12 = sshll.u32 %s2100_s11, 4  ;;  %s38_s10 = int_to_ptr.vmem [resolvable:$true] %s37_s10  ;;  %s2160_s12 = int_to_ptr.vmem [resolvable:$true] %s25_s12 }
   0x5   :  { %s1981_s15 = scalar_lea.hbm %s2460_s2, 1024 }
   0x6   :  { %p1982_p0 = scmp.ne.s32.totalorder %s2460_s2, %s1981_s15  ;;  %p1985_p1 = scmp.lt.u32.totalorder %s1981_s15, %s2460_s2 }
   0x8   :  { %p1987_p2 = pnand %p1985_p1, %p1982_p0 }
   0xa   :  { %1990 = shalt.err (!%p1987_p2)
}
   0xb   :  { %s1991_s20 = scalar_lea.vmem %s38_s10, 1024  ;;  %p1996_p4 = scmp.lt.s32.totalorder %s38_s10, %s38_s10 }
   0xc   :  { %p1992_p3 = scmp.ne.s32.totalorder %s38_s10, %s1991_s20  ;;  %p1997_p5 = scmp.lt.s32.totalorder %s1991_s20, %s1991_s20 }
   0xe   :  { %p1998_p6 = por %p1997_p5, %p1996_p4 }
  0x10   :  { %p1999_p7 = pnand %p1998_p6, %p1992_p3 }
  0x12   :  { %2002 = shalt.err (!%p1999_p7)
}
  0x13   :  { %s2101_s21 = smov 128   ;;  %s2102_s22 = smov 8  }
  0x14   :  { %43 = dma.hbm_to_vmem [thread:$0]  %s2460_s2, 1024, %s38_s10, [#allocation6], %s2101_s21, %s2101_s21, %s2102_s22  }
  0x15   :  { %s2003_s27 = scalar_lea.hbm %s2459_s1, 512 }
  0x16   :  { %p2004_p8 = scmp.ne.s32.totalorder %s2459_s1, %s2003_s27  ;;  %p2007_p9 = scmp.lt.u32.totalorder %s2003_s27, %s2459_s1 }
  0x18   :  { %p2009_p10 = pnand %p2007_p9, %p2004_p8 }
  0x1a   :  { %2012 = shalt.err (!%p2009_p10)
}
  0x1b   :  { %s2013_s13 = scalar_lea.vmem %s2160_s12, 512  ;;  %p2018_p12 = scmp.lt.s32.totalorder %s2160_s12, %s2160_s12 }
  0x1c   :  { %p2014_p11 = scmp.ne.s32.totalorder %s2160_s12, %s2013_s13  ;;  %p2019_p13 = scmp.lt.s32.totalorder %s2013_s13, %s2013_s13 }
  0x1e   :  { %p2020_p0 = por %p2019_p13, %p2018_p12 }
  0x20   :  { %p2021_p1 = pnand %p2020_p0, %p2014_p11 }
  0x22   :  { %2024 = shalt.err (!%p2021_p1)
}
  0x23   :  { %31 = dma.hbm_to_vmem [thread:$0]  %s2459_s1, 512, %s2160_s12, [#allocation3], %s2101_s21, %s2101_s21, %s2102_s22  }
  0x24   :  { %s2103_s14 = smov [#allocation7]   ;;  %s2104_s16 = smov [#allocation8]  }
  0x25   :  { %s53_s15 = sshll.u32 %s2103_s14, 4  ;;  %s67_s17 = sshll.u32 %s2104_s16, 4  ;;  %s54_s15 = int_to_ptr.vmem [resolvable:$true] %s53_s15  ;;  %s2197_s17 = int_to_ptr.vmem [resolvable:$true] %s67_s17 }
  0x26   :  { %s2025_s20 = scalar_lea.hbm %s2463_s5, 6144 }
  0x27   :  { %p2026_p2 = scmp.ne.s32.totalorder %s2463_s5, %s2025_s20  ;;  %p2029_p3 = scmp.lt.u32.totalorder %s2025_s20, %s2463_s5 }
  0x29   :  { %p2031_p4 = pnand %p2029_p3, %p2026_p2 }
  0x2b   :  { %2034 = shalt.err (!%p2031_p4)
}
  0x2c   :  { %s2035_s1 = scalar_lea.vmem %s54_s15, 6144  ;;  %p2040_p6 = scmp.lt.s32.totalorder %s54_s15, %s54_s15 }
  0x2d   :  { %p2036_p5 = scmp.ne.s32.totalorder %s54_s15, %s2035_s1  ;;  %p2041_p7 = scmp.lt.s32.totalorder %s2035_s1, %s2035_s1 }
  0x2f   :  { %p2042_p8 = por %p2041_p7, %p2040_p6 }
  0x31   :  { %p2043_p9 = pnand %p2042_p8, %p2036_p5 }
  0x33   :  { %2046 = shalt.err (!%p2043_p9)
}
  0x34   :  { %59 = dma.hbm_to_vmem [thread:$0]  %s2463_s5, 6144, %s54_s15, [#allocation6], %s2101_s21, %s2101_s21, %s2102_s22  }
  0x35   :  { %s2047_s30 = scalar_lea.hbm %s2465_s7, 6144 }
  0x36   :  { %p2048_p10 = scmp.ne.s32.totalorder %s2465_s7, %s2047_s30  ;;  %p2051_p11 = scmp.lt.u32.totalorder %s2047_s30, %s2465_s7 }
  0x38   :  { %p2053_p12 = pnand %p2051_p11, %p2048_p10 }
  0x3a   :  { %2056 = shalt.err (!%p2053_p12)
}
  0x3b   :  { %s2057_s14 = scalar_lea.vmem %s2197_s17, 6144  ;;  %p2062_p0 = scmp.lt.s32.totalorder %s2197_s17, %s2197_s17 }
  0x3c   :  { %p2058_p13 = scmp.ne.s32.totalorder %s2197_s17, %s2057_s14  ;;  %p2063_p1 = scmp.lt.s32.totalorder %s2057_s14, %s2057_s14 }
  0x3e   :  { %p2064_p2 = por %p2063_p1, %p2062_p0 }
  0x40   :  { %p2065_p3 = pnand %p2064_p2, %p2058_p13 }
  0x42   :  { %2068 = shalt.err (!%p2065_p3)
}
  0x43   :  { %73 = dma.hbm_to_vmem [thread:$0]  %s2465_s7, 6144, %s2197_s17, [#allocation9], %s2101_s21, %s2101_s21, %s2102_s22  }
  0x44   :  { %2091 = dma.done.wait [#allocation3], 512  }
  0x45   :  { %2092 = vsyncadd [#allocation3], 4294966784 }
  0x46   :  { %2093 = dma.done.wait [#allocation6], 7168  }
  0x47   :  { %2094 = vsyncadd [#allocation6], 4294960128 }
  0x48   :  { %2095 = dma.done.wait [#allocation9], 6144  }
  0x49   :  { %2096 = vsyncadd [#allocation9], 4294961152  ;;  %vm91_vm0 = vcmask 64512   ;;  %v88_v0 = vld [vmem:[%s2458_s0] sm:$0xff]  ;;  %v90_v2 = vld [vmem:[%s2462_s4 + $0x8] sm:$0xff]  ;;  %vm188_vm1 = vcmask 523264  }
  0x4a   :  { %v89_v1 = vld [vmem:[%s2462_s4] sm:$0xff]  ;;  %1464 = vmatprep.subr.mxu1 %v88_v0  ;;  %v1299_v3 = vld [vmem:[%s2458_s0 + $0x8] sm:$0xff]  ;;  %v175_v7 = vld [vmem:[#allocation5 + $0x10] sm:$0xff]  ;;  %v2105_v23 = vmov 0.0|0.0   ;;  %vm2106_vm2 = vmmov 0   ;;  %s2108_s25 = smov 64  }
  0x4b   :  { %1466 = vmatprep.mubr.msk.f32.mxu1 %vm91_vm0, %v89_v1  ;;  %v173_v4 = vld [vmem:[#allocation5] sm:$0xff]  ;;  %v174_v5 = vld [vmem:[#allocation5 + $0x8] sm:$0xff]  ;;  %1465 = vmatpush3.msra.mxu1 %v88_v0  ;;  %v176_v8 = vld [vmem:[#allocation5 + $0x18] sm:$0xff]  ;;  %vm455_vm3 = vcmask 1040384   ;;  %vm473_vm5 = vcmask 1041408   ;;  %vm464_vm6 = vcmask 1042432  }
  0x4c   :  { %1488 = vmatprep.subr.mxu0 %v1299_v3  ;;  %v1794_v6 = vpack.c.bf16 %v174_v5, %v173_v4  ;;  %1467 = vmatmul.mubr.msk.f32.vlgmr.msra.gmra.mrb[0].mxu1 %vm91_vm0, %v90_v2  ;;  %v1798_v9 = vpack.c.bf16 %v176_v8, %v175_v7  ;;  %v177_v10 = vld [vmem:[#allocation5 + $0x20] sm:$0xff]  ;;  %v178_v11 = vld [vmem:[#allocation5 + $0x28] sm:$0xff]  ;;  %v179_v13 = vld [vmem:[#allocation5 + $0x30] sm:$0xff]  ;;  %vm513_vm7 = vcmask 1046528   ;;  %vm725_vm8 = vcmask 1045504  }
  0x4d   :  { %1489 = vmatpush3.msra.mxu0 %v1299_v3  ;;  %1490 = vmatprep.mubr.msk.f32.mxu0 %vm91_vm0, %v89_v1  ;;  %v1802_v12 = vpack.c.bf16 %v178_v11, %v177_v10  ;;  %v180_v14 = vld [vmem:[#allocation5 + $0x38] sm:$0xff]  ;;  %v477_v20 = vld [vmem:[#allocation7] sm:$0xff]  ;;  %v478_v21 = vld [vmem:[#allocation7 + $0x8] sm:$0xff] }
  0x4e   :  { %1795 = vmatprep.subr.bf16.mxu1 %v1794_v6  ;;  %1491 = vmatmul.mubr.msk.f32.vlgmr.msra.gmra.mrb[0].mxu0 %vm91_vm0, %v90_v2  ;;  %v1806_v15 = vpack.c.bf16 %v180_v14, %v179_v13  ;;  %v479_v22 = vld [vmem:[#allocation7 + $0x10] sm:$0xff]  ;;  %v1851_v24 = vpack.c.bf16 %v478_v21, %v477_v20  ;;  %v480_v25 = vld [vmem:[#allocation7 + $0x18] sm:$0xff]  ;;  %v494_v26 = vld [vmem:[#allocation7 + $0x80] sm:$0xff]  ;;  %v2107_v2 = vmov 0.0  }
  0x4f   :  { %1797 = vmatpush3.bf16.msra.mxu1 %v1794_v6  ;;  %1811 = vmatprep.subr.bf16.mxu0 %v1794_v6  ;;  %v495_v27 = vld [vmem:[#allocation7 + $0x88] sm:$0xff]  ;;  %v496_v29 = vld [vmem:[#allocation7 + $0x90] sm:$0xff]  ;;  %v1854_v30 = vpack.c.bf16 %v480_v25, %v479_v22  ;;  %v497_v31 = vld [vmem:[#allocation7 + $0x98] sm:$0xff] }
  0x50   :  { %1799 = vmatprep.subr.bf16.mxu1 %v1798_v9  ;;  %1813 = vmatpush3.bf16.msra.mxu0 %v1794_v6  ;;  %v1827_v28 = vpack.c.bf16 %v495_v27, %v494_v26  ;;  %v481_v32 = vld [vmem:[#allocation7 + $0x20] sm:$0xff]  ;;  %v482_v33 = vld [vmem:[#allocation7 + $0x28] sm:$0xff]  ;;  %v1830_v34 = vpack.c.bf16 %v497_v31, %v496_v29  ;;  %v483_v38 = vld [vmem:[#allocation7 + $0x30] sm:$0xff] }
  0x51   :  { %1815 = vmatprep.subr.bf16.mxu0 %v1798_v9  ;;  %v498_v35 = vld [vmem:[#allocation7 + $0xa0] sm:$0xff]  ;;  %v499_v36 = vld [vmem:[#allocation7 + $0xa8] sm:$0xff]  ;;  %v1857_v37 = vpack.c.bf16 %v482_v33, %v481_v32  ;;  %v484_v39 = vld [vmem:[#allocation7 + $0x38] sm:$0xff] }
  0x52   :  { %v1833_v40 = vpack.c.bf16 %v499_v36, %v498_v35  ;;  %v500_v41 = vld [vmem:[#allocation7 + $0xb0] sm:$0xff]  ;;  %v501_v42 = vld [vmem:[#allocation7 + $0xb8] sm:$0xff]  ;;  %v1860_v43 = vpack.c.bf16 %v484_v39, %v483_v38  ;;  %v485_v44 = vld [vmem:[#allocation7 + $0x40] sm:$0xff] }
  0x53   :  { %1801 = vmatpush3.bf16.msra.mxu1 %v1798_v9  ;;  %v486_v45 = vld [vmem:[#allocation7 + $0x48] sm:$0xff]  ;;  %v1836_v46 = vpack.c.bf16 %v501_v42, %v500_v41  ;;  %v502_v47 = vld [vmem:[#allocation7 + $0xc0] sm:$0xff]  ;;  %v487_v50 = vld [vmem:[#allocation7 + $0x50] sm:$0xff] }
  0x54   :  { %1803 = vmatprep.subr.bf16.mxu1 %v1802_v12  ;;  %1817 = vmatpush3.bf16.msra.mxu0 %v1798_v9  ;;  %v503_v48 = vld [vmem:[#allocation7 + $0xc8] sm:$0xff]  ;;  %v1863_v49 = vpack.c.bf16 %v486_v45, %v485_v44  ;;  %v488_v51 = vld [vmem:[#allocation7 + $0x58] sm:$0xff]  ;;  %v504_v53 = vld [vmem:[#allocation7 + $0xd0] sm:$0xff] }
  0x55   :  { %1819 = vmatprep.subr.bf16.mxu0 %v1802_v12  ;;  %v1839_v52 = vpack.c.bf16 %v503_v48, %v502_v47  ;;  %v505_v54 = vld [vmem:[#allocation7 + $0xd8] sm:$0xff]  ;;  %v1866_v55 = vpack.c.bf16 %v488_v51, %v487_v50  ;;  %v489_v56 = vld [vmem:[#allocation7 + $0x60] sm:$0xff]  ;;  %v490_v57 = vld [vmem:[#allocation7 + $0x68] sm:$0xff] }
  0x56   :  { %v1842_v58 = vpack.c.bf16 %v505_v54, %v504_v53  ;;  %v1869_v59 = vpack.c.bf16 %v490_v57, %v489_v56  ;;  %v491_v60 = vld [vmem:[#allocation7 + $0x70] sm:$0xff]  ;;  %v492_v61 = vld [vmem:[#allocation7 + $0x78] sm:$0xff]  ;;  %v506_v63 = vld [vmem:[#allocation7 + $0xe0] sm:$0xff] }
  0x57   :  { %1805 = vmatpush3.bf16.msra.mxu1 %v1802_v12  ;;  %v1872_v62 = vpack.c.bf16 %v492_v61, %v491_v60  ;;  %v507_v0 = vld [vmem:[#allocation7 + $0xe8] sm:$0xff]  ;;  %v508_v3 = vld [vmem:[#allocation7 + $0xf0] sm:$0xff]  ;;  %v509_v4 = vld [vmem:[#allocation7 + $0xf8] sm:$0xff] }
  0x58   :  { %1807 = vmatprep.subr.bf16.mxu1 %v1806_v15  ;;  %1821 = vmatpush3.bf16.msra.mxu0 %v1802_v12  ;;  %v1845_v1 = vpack.c.bf16 %v507_v0, %v506_v63  ;;  %v1848_v5 = vpack.c.bf16 %v509_v4, %v508_v3  ;;  %v1296_v6 = vld [vmem:[%s2461_s3] ss:$0 sm:$0xff]  ;;  %vm2281_vm4 = vmneg %vm455_vm3  ;;  %v271_v22 = vld [vmem:[#allocation2 + $0x8] sm:$0xff] }
  0x59   :  { %1823 = vmatprep.subr.bf16.mxu0 %v1806_v15  ;;  %v442_v26 = vld [vmem:[#allocation2 + $0x18] sm:$0xff]  ;;  %v709_v32 = vld [vmem:[#allocation7 + $0x100] sm:$0xff]  ;;  %v710_v33 = vld [vmem:[#allocation7 + $0x108] sm:$0xff] }
  0x5a   :  { %v712_v44 = vld [vmem:[#allocation7 + $0x118] sm:$0xff]  ;;  %v713_v50 = vld [vmem:[#allocation7 + $0x120] sm:$0xff]  ;;  %v714_v51 = vld [vmem:[#allocation7 + $0x128] sm:$0xff] }
  0x5b   :  { %1809 = vmatpush3.bf16.msra.mxu1 %v1806_v15  ;;  %v1881_v54 = vpack.c.bf16 %v714_v51, %v713_v50  ;;  %v715_v56 = vld [vmem:[#allocation7 + $0x130] sm:$0xff]  ;;  %v716_v57 = vld [vmem:[#allocation7 + $0x138] sm:$0xff]  ;;  %v717_v61 = vld [vmem:[#allocation7 + $0x140] sm:$0xff] }
  0x5c   :  { %1825 = vmatpush3.bf16.msra.mxu0 %v1806_v15  ;;  %1826 = vmatprep.subr.bf16.mxu1 %v2105_v23  ;;  %v270_v15 = vld [vmem:[#allocation2] sm:$0xff]  ;;  %v1884_v60 = vpack.c.bf16 %v716_v57, %v715_v56  ;;  %v719_v0 = vld [vmem:[#allocation7 + $0x150] sm:$0xff] }
  0x5d   :  { %1850 = vmatprep.subr.bf16.mxu0 %v2105_v23  ;;  %v721_v4 = vld [vmem:[#allocation7 + $0x160] sm:$0xff]  ;;  %v913_v57 = vld [vmem:[#allocation8 + $0xd0] sm:$0xff] }
  0x5e   :  { %v911_v51 = vld [vmem:[#allocation8 + $0xc0] sm:$0xff] }
 0x11f   :  { %v1468_v16 = vpop.f32.mrb[0].mxu1 }
 0x120   :  { %v164_v17 = vpop.f32.mrb[1].mxu1 }
 0x121   :  { %1485 = vmatprep.mubr.msk.f32.mxu1 %vm188_vm1, %v164_v17  ;;  %v1492_v18 = vpop.f32.mrb[0].mxu0  ;;  %v441_v17 = vld [vmem:[#allocation2 + $0x10] sm:$0xff] }
 0x122   :  { %1486 = vmatmul.mubr.msk.f32.vlgmr.msra.gmra.mrb[2].mxu1 %vm188_vm1, %v1468_v16  ;;  %v350_v19 = vpop.f32.mrb[1].mxu0 }
 0x123   :  { %1509 = vmatprep.mubr.msk.f32.mxu0 %vm188_vm1, %v350_v19  ;;  %1828 = vmatpush3.bf16.msra.mxu1 %v1827_v28 }
 0x124   :  { %1510 = vmatmul.mubr.msk.f32.vlgmr.msra.gmra.mrb[2].mxu0 %vm188_vm1, %v1492_v18  ;;  %1829 = vmatprep.subr.bf16.mxu1 %v2105_v23 }
 0x125   :  { %1852 = vmatpush3.bf16.msra.mxu0 %v1851_v24  ;;  %1591 = vmatprep.mubr.msk.f32.mxu0 %vm2106_vm2, %v2107_v2 }
 0x126   :  { %1853 = vmatprep.subr.bf16.mxu0 %v2105_v23  ;;  %1544 = vmatprep.mubr.msk.f32.mxu1 %vm2106_vm2, %v2107_v2 }
 0x127   :  { %1831 = vmatpush3.bf16.msra.mxu1 %v1830_v34 }
 0x128   :  { %1832 = vmatprep.subr.bf16.mxu1 %v2105_v23 }
 0x129   :  { %1855 = vmatpush3.bf16.msra.mxu0 %v1854_v30 }
 0x12a   :  { %1856 = vmatprep.subr.bf16.mxu0 %v2105_v23 }
 0x12b   :  { %1834 = vmatpush3.bf16.msra.mxu1 %v1833_v40  ;;  %v1875_v40 = vpack.c.bf16 %v710_v33, %v709_v32  ;;  %v905_v33 = vld [vmem:[#allocation8 + $0x90] sm:$0xff] }
 0x12c   :  { %1835 = vmatprep.subr.bf16.mxu1 %v2105_v23 }
 0x12d   :  { %1858 = vmatpush3.bf16.msra.mxu0 %v1857_v37 }
 0x12e   :  { %1859 = vmatprep.subr.bf16.mxu0 %v2105_v23 }
 0x12f   :  { %1837 = vmatpush3.bf16.msra.mxu1 %v1836_v46 }
 0x130   :  { %1838 = vmatprep.subr.bf16.mxu1 %v2105_v23 }
 0x131   :  { %1861 = vmatpush3.bf16.msra.mxu0 %v1860_v43  ;;  %v711_v43 = vld [vmem:[#allocation7 + $0x110] sm:$0xff] }
 0x132   :  { %1862 = vmatprep.subr.bf16.mxu0 %v2105_v23  ;;  %v1878_v48 = vpack.c.bf16 %v712_v44, %v711_v43 }
 0x133   :  { %1840 = vmatpush3.bf16.msra.mxu1 %v1839_v52 }
 0x134   :  { %1841 = vmatprep.subr.bf16.mxu1 %v2105_v23 }
 0x135   :  { %1864 = vmatpush3.bf16.msra.mxu0 %v1863_v49 }
 0x136   :  { %1865 = vmatprep.subr.bf16.mxu0 %v2105_v23 }
 0x137   :  { %1843 = vmatpush3.bf16.msra.mxu1 %v1842_v58 }
 0x138   :  { %1844 = vmatprep.subr.bf16.mxu1 %v2105_v23 }
 0x139   :  { %1867 = vmatpush3.bf16.msra.mxu0 %v1866_v55 }
 0x13a   :  { %1868 = vmatprep.subr.bf16.mxu0 %v2105_v23 }
 0x13b   :  { %1846 = vmatpush3.bf16.msra.mxu1 %v1845_v1  ;;  %v720_v1 = vld [vmem:[#allocation7 + $0x158] sm:$0xff] }
 0x13c   :  { %1847 = vmatprep.subr.bf16.mxu1 %v2105_v23  ;;  %v1890_v3 = vpack.c.bf16 %v720_v1, %v719_v0  ;;  %v916_v0 = vld [vmem:[#allocation8 + $0xe8] sm:$0xff] }
 0x13d   :  { %1870 = vmatpush3.bf16.msra.mxu0 %v1869_v59 }
 0x13e   :  { %1871 = vmatprep.subr.bf16.mxu0 %v2105_v23 }
 0x13f   :  { %1849 = vmatpush3.bf16.msra.mxu1 %v1848_v5  ;;  %v722_v5 = vld [vmem:[#allocation7 + $0x168] sm:$0xff] }
 0x140   :  { %1874 = vmatprep.subr.bf16.mxu1 %v2105_v23 }
 0x141   :  { %1873 = vmatpush3.bf16.msra.mxu0 %v1872_v62  ;;  %v718_v62 = vld [vmem:[#allocation7 + $0x148] sm:$0xff] }
 0x142   :  { %1898 = vmatprep.subr.bf16.mxu0 %v2105_v23  ;;  %v1887_v63 = vpack.c.bf16 %v718_v62, %v717_v61  ;;  %v901_v61 = vld [vmem:[#allocation8 + $0x78] sm:$0xff] }
 0x1f5   :  { %v1487_v7 = vpop.f32.mrb[2].mxu1 }
 0x1f6   :  { %v261_v8 = vpop.f32.mrb[3].mxu1  ;;  %v267_v13 = vadd.f32 %v1487_v7, %v1296_v6  ;;  %v723_v7 = vld [vmem:[#allocation7 + $0x170] sm:$0xff] }
 0x1f7   :  { %v262_v9 = vadd.f32 %v1296_v6, %v261_v8  ;;  %v1511_v10 = vpop.f32.mrb[2].mxu0  ;;  %v724_v8 = vld [vmem:[#allocation7 + $0x178] sm:$0xff] }
 0x1f8   :  { %v431_v11 = vpop.f32.mrb[3].mxu0  ;;  %v437_v14 = vadd.f32 %v1511_v10, %v1296_v6 }
 0x1f9   :  { %v432_v12 = vadd.f32 %v1296_v6, %v431_v11  ;;  %274 = vrot.lane.b32.xlu0 %v262_v9, %s2108_s25  ;;  %v1893_v6 = vpack.c.bf16 %v722_v5, %v721_v4  ;;  %v1896_v9 = vpack.c.bf16 %v724_v8, %v723_v7  ;;  %v918_v4 = vld [vmem:[#allocation8 + $0xf8] sm:$0xff] }
 0x1fb   :  { %445 = vrot.lane.b32.xlu1 %v432_v12, %s2108_s25 }
 0x1fd   :  { %276 = vrot.lane.b32.xlu0 %v267_v13, %s2108_s25 }
 0x1ff   :  { %447 = vrot.lane.b32.xlu1 %v437_v14, %s2108_s25 }
 0x26b   :  { %v275_v16 = vpop.permute.xlu0 %274 }
 0x26c   :  { %v280_v18 = vsel %vm188_vm1, %v270_v15, %v275_v16 }
 0x26d   :  { %v456_v20 = vrot.slane %v280_v18, 7  ;;  %v446_v21 = vpop.permute.xlu1 %445 }
 0x26e   :  { %v451_v24 = vsel %vm188_vm1, %v441_v17, %v446_v21  ;;  %v887_v21 = vld [vmem:[#allocation8 + $0x8] sm:$0xff] }
 0x26f   :  { %1592 = vmatmul.mubr.msk.f32.vlgmr.msra.gmra.mrb[4].mxu0 %vm2281_vm4, %v456_v20  ;;  %v277_v25 = vpop.permute.xlu0 %276  ;;  %v2292_v28 = vsel %vm455_vm3, 0.0, %v456_v20  ;;  %v465_v29 = vrot.slane %v451_v24, 5  ;;  %v888_v24 = vld [vmem:[#allocation8 + $0x10] sm:$0xff] }
 0x270   :  { %v281_v27 = vsel %vm188_vm1, %v271_v22, %v277_v25  ;;  %1594 = vmatprep.mubr.msk.f32.mxu0 %vm2106_vm2, %v2107_v2  ;;  %v514_v38 = vrot.slane %v2292_v28, 1  ;;  %v726_v11 = vrot.slane %v2292_v28, 2  ;;  %v889_v25 = vld [vmem:[#allocation8 + $0x18] sm:$0xff]  ;;  %v904_v28 = vld [vmem:[#allocation8 + $0x88] sm:$0xff] }
 0x271   :  { %v457_v30 = vrot.slane %v281_v27, 7  ;;  %v448_v31 = vpop.permute.xlu1 %447  ;;  %v903_v27 = vld [vmem:[#allocation8 + $0x80] sm:$0xff] }
 0x272   :  { %v452_v34 = vsel %vm188_vm1, %v442_v26, %v448_v31  ;;  %v1926_v26 = vpack.c.bf16 %v889_v25, %v888_v24  ;;  %v891_v31 = vld [vmem:[#allocation8 + $0x28] sm:$0xff] }
 0x273   :  { %v472_v35 = vsel %vm455_vm3, %v457_v30, 0.0  ;;  %v466_v36 = vrot.slane %v452_v34, 5  ;;  %v2297_v37 = vsel %vm455_vm3, %v456_v20, %v457_v30  ;;  %v886_v20 = vld [vmem:[#allocation8] sm:$0xff]  ;;  %v906_v34 = vld [vmem:[#allocation8 + $0x98] sm:$0xff] }
 0x274   :  { %v515_v39 = vrot.slane %v2297_v37, 1  ;;  %1595 = vmatmul.mubr.f32.gmra.mrb[6].mxu0 %v2297_v37  ;;  %v474_v41 = vsel %vm473_vm5, %v472_v35, 0.0  ;;  %v727_v10 = vrot.slane %v2297_v37, 2  ;;  %v1923_v22 = vpack.c.bf16 %v887_v21, %v886_v20  ;;  %v890_v30 = vld [vmem:[#allocation8 + $0x20] sm:$0xff]  ;;  %v892_v35 = vld [vmem:[#allocation8 + $0x30] sm:$0xff]  ;;  %v893_v37 = vld [vmem:[#allocation8 + $0x38] sm:$0xff] }
 0x275   :  { %1597 = vmatprep.mubr.msk.f32.mxu0 %vm2106_vm2, %v2107_v2  ;;  %v2306_v42 = vsel %vm464_vm6, %v474_v41, %v465_v29  ;;  %v2311_v47 = vsel %vm464_vm6, %v465_v29, %v466_v36  ;;  %v2315_v49 = vsel %vm464_vm6, %v466_v36, 0.0  ;;  %v1899_v29 = vpack.c.bf16 %v904_v28, %v903_v27  ;;  %v894_v41 = vld [vmem:[#allocation8 + $0x40] sm:$0xff] }
 0x276   :  { %v516_v45 = vsel %vm513_vm7, %v514_v38, %v515_v39  ;;  %v517_v46 = vrot.slane %v2306_v42, 1  ;;  %v519_v53 = vrot.slane %v2311_v47, 1  ;;  %v521_v55 = vrot.slane %v2315_v49, 1 }
 0x277   :  { %1545 = vmatmul.mubr.f32.vlgmr.msra.gmra.mrb[4].mxu1 %v516_v45  ;;  %v729_v12 = vrot.slane %v2306_v42, 2  ;;  %v728_v13 = vsel %vm725_vm8, %v726_v11, %v727_v10  ;;  %v731_v14 = vrot.slane %v2311_v47, 2  ;;  %v733_v17 = vrot.slane %v2315_v49, 2  ;;  %1900 = vmatpush3.bf16.msra.mxu0 %v1899_v29  ;;  %v909_v45 = vld [vmem:[#allocation8 + $0xb0] sm:$0xff] }
 0x278   :  { %1876 = vmatpush3.bf16.msra.mxu1 %v1875_v40  ;;  %1598 = vmatmul.mubr.f32.gmra.mrb[8].mxu0 %v2306_v42  ;;  %v518_v52 = vsel %vm513_vm7, %v515_v39, %v517_v46  ;;  %v520_v58 = vsel %vm513_vm7, %v517_v46, %v519_v53  ;;  %v522_v59 = vsel %vm513_vm7, %v519_v53, %v521_v55  ;;  %v907_v39 = vld [vmem:[#allocation8 + $0xa0] sm:$0xff]  ;;  %v908_v40 = vld [vmem:[#allocation8 + $0xa8] sm:$0xff]  ;;  %v910_v46 = vld [vmem:[#allocation8 + $0xb8] sm:$0xff] }
 0x279   :  { %1547 = vmatprep.mubr.msk.f32.mxu1 %vm2106_vm2, %v2107_v2  ;;  %1877 = vmatprep.subr.bf16.mxu1 %v2105_v23  ;;  %v730_v15 = vsel %vm725_vm8, %v727_v10, %v729_v12  ;;  %v732_v16 = vsel %vm725_vm8, %v729_v12, %v731_v14  ;;  %v734_v18 = vsel %vm725_vm8, %v731_v14, %v733_v17  ;;  %v895_v42 = vld [vmem:[#allocation8 + $0x48] sm:$0xff] }
 0x27a   :  { %1600 = vmatprep.mubr.msk.f32.mxu0 %vm2106_vm2, %v2107_v2  ;;  %v1929_v32 = vpack.c.bf16 %v891_v31, %v890_v30  ;;  %1901 = vmatprep.subr.bf16.mxu0 %v2105_v23  ;;  %v1932_v38 = vpack.c.bf16 %v893_v37, %v892_v35  ;;  %v1905_v43 = vpack.c.bf16 %v908_v40, %v907_v39 }
 0x27b   :  { %1548 = vmatmul.mubr.f32.gmra.mrb[6].mxu1 %v518_v52  ;;  %v1935_v44 = vpack.c.bf16 %v895_v42, %v894_v41  ;;  %v1908_v49 = vpack.c.bf16 %v910_v46, %v909_v45  ;;  %v912_v52 = vld [vmem:[#allocation8 + $0xc8] sm:$0xff] }
 0x27c   :  { %1879 = vmatpush3.bf16.msra.mxu1 %v1878_v48  ;;  %1601 = vmatmul.mubr.f32.gmra.mrb[10].mxu0 %v2311_v47  ;;  %v896_v47 = vld [vmem:[#allocation8 + $0x50] sm:$0xff]  ;;  %v897_v48 = vld [vmem:[#allocation8 + $0x58] sm:$0xff]  ;;  %v1911_v53 = vpack.c.bf16 %v912_v52, %v911_v51  ;;  %v1117_v52 = vld [vmem:[#allocation8 + $0x100] sm:$0xff] }
 0x27d   :  { %1550 = vmatprep.mubr.msk.f32.mxu1 %vm2106_vm2, %v2107_v2  ;;  %1880 = vmatprep.subr.bf16.mxu1 %v2105_v23  ;;  %v1938_v50 = vpack.c.bf16 %v897_v48, %v896_v47 }
 0x27e   :  { %1603 = vmatprep.mubr.msk.f32.mxu0 %vm2106_vm2, %v2107_v2 }
 0x27f   :  { %1551 = vmatmul.mubr.f32.gmra.mrb[8].mxu1 %v520_v58  ;;  %v914_v58 = vld [vmem:[#allocation8 + $0xd8] sm:$0xff] }
 0x280   :  { %1882 = vmatpush3.bf16.msra.mxu1 %v1881_v54  ;;  %1604 = vmatmul.mubr.msk.f32.gmra.mrb[12].mxu0 %vm464_vm6, %v466_v36  ;;  %v1902_v36 = vpack.c.bf16 %v906_v34, %v905_v33  ;;  %v898_v54 = vld [vmem:[#allocation8 + $0x60] sm:$0xff] }
 0x281   :  { %1553 = vmatprep.mubr.msk.f32.mxu1 %vm2106_vm2, %v2107_v2  ;;  %1883 = vmatprep.subr.bf16.mxu1 %v2105_v23  ;;  %v1307_v34 = vld [vmem:[%s2464_s6] ss:$0 sm:$0xff] }
 0x282   :  { %1685 = vmatprep.mubr.msk.f32.mxu0 %vm2106_vm2, %v2107_v2  ;;  %1903 = vmatpush3.bf16.msra.mxu0 %v1902_v36 }
 0x283   :  { %1554 = vmatmul.mubr.f32.gmra.mrb[10].mxu1 %v522_v59  ;;  %1904 = vmatprep.subr.bf16.mxu0 %v2105_v23  ;;  %v1914_v59 = vpack.c.bf16 %v914_v58, %v913_v57 }
 0x284   :  { %1885 = vmatpush3.bf16.msra.mxu1 %v1884_v60  ;;  %1556 = vmatprep.mubr.msk.f32.mxu1 %vm2106_vm2, %v2107_v2  ;;  %v900_v60 = vld [vmem:[#allocation8 + $0x70] sm:$0xff] }
 0x285   :  { %1886 = vmatprep.subr.bf16.mxu1 %v2105_v23  ;;  %v1944_v62 = vpack.c.bf16 %v901_v61, %v900_v60 }
 0x286   :  { %1906 = vmatpush3.bf16.msra.mxu0 %v1905_v43 }
 0x287   :  { %1557 = vmatmul.mubr.f32.gmra.mrb[12].mxu1 %v521_v55  ;;  %1907 = vmatprep.subr.bf16.mxu0 %v2105_v23  ;;  %v899_v55 = vld [vmem:[#allocation8 + $0x68] sm:$0xff] }
 0x288   :  { %1888 = vmatpush3.bf16.msra.mxu1 %v1887_v63  ;;  %1638 = vmatprep.mubr.msk.f32.mxu1 %vm2106_vm2, %v2107_v2  ;;  %v1941_v56 = vpack.c.bf16 %v899_v55, %v898_v54  ;;  %v915_v63 = vld [vmem:[#allocation8 + $0xe0] sm:$0xff] }
 0x289   :  { %1889 = vmatprep.subr.bf16.mxu1 %v2105_v23  ;;  %v1917_v1 = vpack.c.bf16 %v916_v0, %v915_v63 }
 0x28a   :  { %1909 = vmatpush3.bf16.msra.mxu0 %v1908_v49 }
 0x28b   :  { %1910 = vmatprep.subr.bf16.mxu0 %v2105_v23 }
 0x28c   :  { %1891 = vmatpush3.bf16.msra.mxu1 %v1890_v3  ;;  %v917_v3 = vld [vmem:[#allocation8 + $0xf0] sm:$0xff] }
 0x28d   :  { %1892 = vmatprep.subr.bf16.mxu1 %v2105_v23  ;;  %v1920_v5 = vpack.c.bf16 %v918_v4, %v917_v3  ;;  %v1119_v3 = vld [vmem:[#allocation8 + $0x110] sm:$0xff]  ;;  %v1120_v4 = vld [vmem:[#allocation8 + $0x118] sm:$0xff] }
 0x28e   :  { %1912 = vmatpush3.bf16.msra.mxu0 %v1911_v53  ;;  %v1118_v53 = vld [vmem:[#allocation8 + $0x108] sm:$0xff] }
 0x28f   :  { %1913 = vmatprep.subr.bf16.mxu0 %v2105_v23  ;;  %v1947_v19 = vpack.c.bf16 %v1118_v53, %v1117_v52  ;;  %v1130_v52 = vld [vmem:[#allocation8 + $0x168] sm:$0xff] }
 0x290   :  { %1894 = vmatpush3.bf16.msra.mxu1 %v1893_v6 }
 0x291   :  { %1895 = vmatprep.subr.bf16.mxu1 %v2105_v23 }
 0x292   :  { %1915 = vmatpush3.bf16.msra.mxu0 %v1914_v59 }
 0x293   :  { %1916 = vmatprep.subr.bf16.mxu0 %v2105_v23 }
 0x294   :  { %1897 = vmatpush3.bf16.msra.mxu1 %v1896_v9 }
 0x295   :  { %1922 = vmatprep.subr.bf16.mxu1 %v2105_v23 }
 0x296   :  { %1918 = vmatpush3.bf16.msra.mxu0 %v1917_v1 }
 0x297   :  { %1639 = vmatmul.mubr.f32.vlgmr.msra.gmra.mrb[14].mxu1 %v728_v13  ;;  %1919 = vmatprep.subr.bf16.mxu0 %v2105_v23 }
 0x298   :  { %1641 = vmatprep.mubr.msk.f32.mxu1 %vm2106_vm2, %v2107_v2  ;;  %1924 = vmatpush3.bf16.msra.mxu1 %v1923_v22 }
 0x299   :  { %1925 = vmatprep.subr.bf16.mxu1 %v2105_v23 }
 0x29a   :  { %1921 = vmatpush3.bf16.msra.mxu0 %v1920_v5 }
 0x29b   :  { %1642 = vmatmul.mubr.f32.gmra.mrb[16].mxu1 %v730_v15  ;;  %1946 = vmatprep.subr.bf16.mxu0 %v2105_v23 }
 0x29c   :  { %1644 = vmatprep.mubr.msk.f32.mxu1 %vm2106_vm2, %v2107_v2  ;;  %1927 = vmatpush3.bf16.msra.mxu1 %v1926_v26 }
 0x29d   :  { %1928 = vmatprep.subr.bf16.mxu1 %v2105_v23 }
 0x29f   :  { %1645 = vmatmul.mubr.f32.gmra.mrb[18].mxu1 %v732_v16 }
 0x2a0   :  { %1647 = vmatprep.mubr.msk.f32.mxu1 %vm2106_vm2, %v2107_v2  ;;  %1930 = vmatpush3.bf16.msra.mxu1 %v1929_v32 }
 0x2a1   :  { %1931 = vmatprep.subr.bf16.mxu1 %v2105_v23 }
 0x2a3   :  { %1648 = vmatmul.mubr.f32.gmra.mrb[20].mxu1 %v734_v18 }
 0x2a4   :  { %1650 = vmatprep.mubr.msk.f32.mxu1 %vm2106_vm2, %v2107_v2  ;;  %1933 = vmatpush3.bf16.msra.mxu1 %v1932_v38 }
 0x2a5   :  { %1934 = vmatprep.subr.bf16.mxu1 %v2105_v23 }
 0x2a7   :  { %1651 = vmatmul.mubr.f32.gmra.mrb[22].mxu1 %v733_v17 }
 0x2a8   :  { %1732 = vmatprep.mubr.msk.f32.mxu1 %vm2106_vm2, %v2107_v2  ;;  %1936 = vmatpush3.bf16.msra.mxu1 %v1935_v44 }
 0x2a9   :  { %1937 = vmatprep.subr.bf16.mxu1 %v2105_v23 }
 0x2ac   :  { %1939 = vmatpush3.bf16.msra.mxu1 %v1938_v50 }
 0x2ad   :  { %1940 = vmatprep.subr.bf16.mxu1 %v2105_v23 }
 0x2b0   :  { %1942 = vmatpush3.bf16.msra.mxu1 %v1941_v56 }
 0x2b1   :  { %1943 = vmatprep.subr.bf16.mxu1 %v2105_v23 }
 0x2b4   :  { %1945 = vmatpush3.bf16.msra.mxu1 %v1944_v62 }
 0x342   :  { %v684_v6 = vpop.f32.mrb[4].mxu0 }
 0x343   :  { %v1593_v7 = vpop.f32.mrb[5].mxu0 }
 0x347   :  { %v689_v8 = vpop.f32.mrb[6].mxu0 }
 0x348   :  { %v1596_v9 = vpop.f32.mrb[7].mxu0 }
 0x34a   :  { %v594_v10 = vpop.f32.mrb[4].mxu1 }
 0x34b   :  { %v685_v11 = vadd.f32 %v684_v6, %v594_v10  ;;  %v1546_v12 = vpop.f32.mrb[5].mxu1  ;;  %v694_v13 = vpop.f32.mrb[8].mxu0 }
 0x34c   :  { %v1599_v14 = vpop.f32.mrb[9].mxu0 }
 0x34d   :  { %v1950_v14 = vpack.c.bf16 %v1120_v4, %v1119_v3 }
 0x34e   :  { %v599_v15 = vpop.f32.mrb[6].mxu1 }
 0x34f   :  { %v690_v16 = vadd.f32 %v689_v8, %v599_v15  ;;  %v1549_v17 = vpop.f32.mrb[7].mxu1  ;;  %v699_v18 = vpop.f32.mrb[10].mxu0 }
 0x350   :  { %v1602_v20 = vpop.f32.mrb[11].mxu0 }
 0x352   :  { %v604_v21 = vpop.f32.mrb[8].mxu1 }
 0x353   :  { %v695_v22 = vadd.f32 %v694_v13, %v604_v21  ;;  %v1552_v24 = vpop.f32.mrb[9].mxu1  ;;  %v704_v25 = vpop.f32.mrb[12].mxu0 }
 0x354   :  { %v1605_v26 = vpop.f32.mrb[13].mxu0  ;;  %v1122_v24 = vld [vmem:[#allocation8 + $0x128] sm:$0xff] }
 0x356   :  { %v609_v27 = vpop.f32.mrb[10].mxu1 }
 0x357   :  { %v700_v28 = vadd.f32 %v699_v18, %v609_v27  ;;  %v1555_v29 = vpop.f32.mrb[11].mxu1 }
 0x35a   :  { %v614_v30 = vpop.f32.mrb[12].mxu1 }
 0x35b   :  { %v705_v31 = vadd.f32 %v704_v25, %v614_v30  ;;  %v1558_v32 = vpop.f32.mrb[13].mxu1 }
 0x36a   :  { %v806_v33 = vpop.f32.mrb[14].mxu1 }
 0x36b   :  { %v830_v35 = vadd.f32 %v806_v33, %v685_v11  ;;  %v1640_v36 = vpop.f32.mrb[15].mxu1 }
 0x36d   :  { %v842_v37 = vadd.f32 %v1307_v34, %v830_v35  ;;  %v1124_v35 = vld [vmem:[#allocation8 + $0x138] sm:$0xff] }
 0x36e   :  { %v811_v38 = vpop.f32.mrb[16].mxu1 }
 0x36f   :  { %vm847_vm9 = vcmp.gt.f32.partialorder %v842_v37, 0.0  ;;  %v852_v39 = vmul.f32 0.01, %v842_v37  ;;  %v831_v40 = vadd.f32 %v811_v38, %v690_v16  ;;  %v1643_v41 = vpop.f32.mrb[17].mxu1 }
 0x371   :  { %v857_v42 = vsel %vm847_vm9, %v842_v37, %v852_v39  ;;  %v843_v43 = vadd.f32 %v1307_v34, %v831_v40 }
 0x372   :  { %v864_v44 = vrot.slane %v857_v42, 7  ;;  %v816_v45 = vpop.f32.mrb[18].mxu1 }
 0x373   :  { %vm848_vm10 = vcmp.gt.f32.partialorder %v843_v43, 0.0  ;;  %v853_v46 = vmul.f32 0.01, %v843_v43  ;;  %v832_v47 = vadd.f32 %v816_v45, %v695_v22  ;;  %v1646_v48 = vpop.f32.mrb[19].mxu1  ;;  %v1121_v22 = vld [vmem:[#allocation8 + $0x120] sm:$0xff] }
 0x374   :  { %1733 = vmatmul.mubr.msk.f32.vlgmr.msra.gmra.mrb[24].mxu1 %vm2281_vm4, %v864_v44  ;;  %v881_v51 = vsel %vm455_vm3, 0.0, %v864_v44  ;;  %v1953_v32 = vpack.c.bf16 %v1122_v24, %v1121_v22  ;;  %v1127_v48 = vld [vmem:[#allocation8 + $0x150] sm:$0xff] }
 0x375   :  { %v844_v49 = vadd.f32 %v1307_v34, %v832_v47  ;;  %1735 = vmatprep.mubr.msk.f32.mxu1 %vm2106_vm2, %v2107_v2  ;;  %v858_v50 = vsel %vm848_vm10, %v843_v43, %v853_v46  ;;  %v922_v60 = vrot.slane %v881_v51, 1  ;;  %v1133_v8 = vrot.slane %v881_v51, 2  ;;  %v1125_v43 = vld [vmem:[#allocation8 + $0x140] sm:$0xff] }
 0x376   :  { %v821_v54 = vpop.f32.mrb[20].mxu1  ;;  %v865_v55 = vrot.slane %v858_v50, 7  ;;  %v1129_v51 = vld [vmem:[#allocation8 + $0x160] sm:$0xff] }
 0x377   :  { %vm849_vm11 = vcmp.gt.f32.partialorder %v844_v49, 0.0  ;;  %v854_v56 = vmul.f32 0.01, %v844_v49  ;;  %v833_v57 = vadd.f32 %v821_v54, %v700_v28  ;;  %v1649_v58 = vpop.f32.mrb[21].mxu1  ;;  %v1965_v53 = vpack.c.bf16 %v1130_v52, %v1129_v51  ;;  %v1131_v54 = vld [vmem:[#allocation8 + $0x170] sm:$0xff] }
 0x378   :  { %v866_v59 = vsel %vm455_vm3, %v864_v44, %v865_v55  ;;  %v882_v61 = vsel %vm455_vm3, %v865_v55, 0.0  ;;  %v1126_v44 = vld [vmem:[#allocation8 + $0x148] sm:$0xff]  ;;  %v1132_v55 = vld [vmem:[#allocation8 + $0x178] sm:$0xff] }
 0x379   :  { %v845_v62 = vadd.f32 %v1307_v34, %v833_v57  ;;  %v923_v63 = vrot.slane %v866_v59, 1  ;;  %1736 = vmatmul.mubr.f32.gmra.mrb[26].mxu1 %v866_v59  ;;  %v1134_v0 = vrot.slane %v866_v59, 2  ;;  %v859_v1 = vsel %vm849_vm11, %v844_v49, %v854_v56  ;;  %v1128_v49 = vld [vmem:[#allocation8 + $0x158] sm:$0xff] }
 0x37a   :  { %v826_v5 = vpop.f32.mrb[22].mxu1  ;;  %1738 = vmatprep.mubr.msk.f32.mxu1 %vm2106_vm2, %v2107_v2  ;;  %v873_v6 = vrot.slane %v859_v1, 7  ;;  %v883_v7 = vsel %vm473_vm5, %v882_v61, 0.0  ;;  %v1959_v47 = vpack.c.bf16 %v1126_v44, %v1125_v43  ;;  %v1962_v50 = vpack.c.bf16 %v1128_v49, %v1127_v48 }
 0x37b   :  { %vm850_vm12 = vcmp.gt.f32.partialorder %v845_v62, 0.0  ;;  %v855_v9 = vmul.f32 0.01, %v845_v62  ;;  %v834_v10 = vadd.f32 %v826_v5, %v705_v31  ;;  %v1652_v11 = vpop.f32.mrb[23].mxu1  ;;  %v924_v12 = vsel %vm513_vm7, %v922_v60, %v923_v63 }
 0x37c   :  { %1686 = vmatmul.mubr.f32.vlgmr.msra.gmra.mrb[14].mxu0 %v924_v12  ;;  %v884_v13 = vsel %vm464_vm6, %v883_v7, %v873_v6  ;;  %v2398_v15 = vsel %vm725_vm8, %v1133_v8, %v1134_v0  ;;  %v1968_v56 = vpack.c.bf16 %v1132_v55, %v1131_v54 }
 0x37d   :  { %v846_v16 = vadd.f32 %v1307_v34, %v834_v10  ;;  %1948 = vmatpush3.bf16.msra.mxu0 %v1947_v19  ;;  %v925_v17 = vrot.slane %v884_v13, 1  ;;  %1739 = vmatmul.mubr.f32.gmra.mrb[28].mxu1 %v884_v13  ;;  %v1136_v18 = vrot.slane %v884_v13, 2  ;;  %v860_v20 = vsel %vm850_vm12, %v845_v62, %v855_v9  ;;  %v1123_v34 = vld [vmem:[#allocation8 + $0x130] sm:$0xff] }
 0x37e   :  { %1688 = vmatprep.mubr.msk.f32.mxu0 %vm2106_vm2, %v2107_v2  ;;  %1949 = vmatprep.subr.bf16.mxu0 %v2105_v23  ;;  %v874_v21 = vrot.slane %v860_v20, 7  ;;  %v1956_v40 = vpack.c.bf16 %v1124_v35, %v1123_v34 }
 0x37f   :  { %vm851_vm13 = vcmp.gt.f32.partialorder %v846_v16, 0.0  ;;  %v856_v25 = vmul.f32 0.01, %v846_v16  ;;  %v926_v26 = vsel %vm513_vm7, %v923_v63, %v925_v17  ;;  %1741 = vmatprep.mubr.msk.f32.mxu1 %vm2106_vm2, %v2107_v2  ;;  %v1137_v27 = vsel %vm725_vm8, %v1134_v0, %v1136_v18 }
 0x380   :  { %1689 = vmatmul.mubr.f32.gmra.mrb[16].mxu0 %v926_v26  ;;  %v875_v28 = vsel %vm455_vm3, %v873_v6, %v874_v21 }
 0x381   :  { %v861_v29 = vsel %vm851_vm13, %v846_v16, %v856_v25  ;;  %1951 = vmatpush3.bf16.msra.mxu0 %v1950_v14  ;;  %v927_v30 = vrot.slane %v875_v28, 1  ;;  %1742 = vmatmul.mubr.f32.gmra.mrb[30].mxu1 %v875_v28  ;;  %v1138_v31 = vrot.slane %v875_v28, 2 }
 0x382   :  { %v876_v33 = vrot.slane %v861_v29, 7  ;;  %1691 = vmatprep.mubr.msk.f32.mxu0 %vm2106_vm2, %v2107_v2  ;;  %1952 = vmatprep.subr.bf16.mxu0 %v2105_v23 }
 0x383   :  { %v928_v36 = vsel %vm513_vm7, %v925_v17, %v927_v30  ;;  %1744 = vmatprep.mubr.msk.f32.mxu1 %vm2106_vm2, %v2107_v2  ;;  %v1139_v37 = vsel %vm725_vm8, %v1136_v18, %v1138_v31  ;;  %v1311_v17 = vld [vmem:[%s2466_s8] ss:$0 sm:$0xff]  ;;  %s2109_s8 = smov [#allocation10]  }
 0x384   :  { %1692 = vmatmul.mubr.f32.gmra.mrb[18].mxu0 %v928_v36  ;;  %v877_v38 = vsel %vm455_vm3, %v874_v21, %v876_v33  ;;  %s1280_s12 = sshll.u32 %s2109_s8, 4  ;;  %s1281_s12 = int_to_ptr.vmem [resolvable:$true] %s1280_s12 }
 0x385   :  { %1954 = vmatpush3.bf16.msra.mxu0 %v1953_v32  ;;  %v885_v39 = vsel %vm464_vm6, %v877_v38, 0.0  ;;  %1745 = vmatmul.mubr.msk.f32.gmra.mrb[32].mxu1 %vm464_vm6, %v877_v38  ;;  %s2069_s27 = scalar_lea.vmem %s1281_s12, 512  ;;  %p2074_p5 = scmp.lt.s32.totalorder %s1281_s12, %s1281_s12 }
 0x386   :  { %v929_v41 = vrot.slane %v885_v39, 1  ;;  %v1140_v42 = vrot.slane %v885_v39, 2  ;;  %1955 = vmatprep.subr.bf16.mxu0 %v2105_v23  ;;  %1694 = vmatprep.mubr.msk.f32.mxu0 %vm2106_vm2, %v2107_v2  ;;  %p2070_p4 = scmp.ne.s32.totalorder %s1281_s12, %s2069_s27  ;;  %p2075_p6 = scmp.lt.s32.totalorder %s2069_s27, %s2069_s27 }
 0x388   :  { %v930_v45 = vsel %vm513_vm7, %v927_v30, %v929_v41  ;;  %v1141_v46 = vsel %vm725_vm8, %v1138_v31, %v1140_v42  ;;  %p2076_p7 = por %p2075_p6, %p2074_p5 }
 0x389   :  { %1957 = vmatpush3.bf16.msra.mxu0 %v1956_v40 }
 0x38a   :  { %1695 = vmatmul.mubr.f32.gmra.mrb[20].mxu0 %v930_v45  ;;  %1958 = vmatprep.subr.bf16.mxu0 %v2105_v23  ;;  %p2077_p8 = pnand %p2076_p7, %p2070_p4 }
 0x38b   :  { %1697 = vmatprep.mubr.msk.f32.mxu0 %vm2106_vm2, %v2107_v2 }
 0x38d   :  { %1960 = vmatpush3.bf16.msra.mxu0 %v1959_v47 }
 0x38e   :  { %1698 = vmatmul.mubr.f32.gmra.mrb[22].mxu0 %v929_v41  ;;  %1961 = vmatprep.subr.bf16.mxu0 %v2105_v23 }
 0x38f   :  { %1779 = vmatprep.mubr.msk.f32.mxu0 %vm2106_vm2, %v2107_v2 }
 0x391   :  { %1963 = vmatpush3.bf16.msra.mxu0 %v1962_v50 }
 0x392   :  { %1964 = vmatprep.subr.bf16.mxu0 %v2105_v23 }
 0x395   :  { %1966 = vmatpush3.bf16.msra.mxu0 %v1965_v53 }
 0x396   :  { %1967 = vmatprep.subr.bf16.mxu0 %v2105_v23 }
 0x399   :  { %1969 = vmatpush3.bf16.msra.mxu0 %v1968_v56 }
 0x39c   :  { %1780 = vmatmul.mubr.f32.vlgmr.msra.gmra.mrb[24].mxu0 %v2398_v15 }
 0x39d   :  { %1782 = vmatprep.mubr.msk.f32.mxu0 %vm2106_vm2, %v2107_v2 }
 0x3a0   :  { %1783 = vmatmul.mubr.f32.gmra.mrb[26].mxu0 %v1137_v27 }
 0x3a1   :  { %1785 = vmatprep.mubr.msk.f32.mxu0 %vm2106_vm2, %v2107_v2 }
 0x3a4   :  { %1786 = vmatmul.mubr.f32.gmra.mrb[28].mxu0 %v1139_v37 }
 0x3a5   :  { %1788 = vmatprep.mubr.msk.f32.mxu0 %vm2106_vm2, %v2107_v2 }
 0x3a8   :  { %1789 = vmatmul.mubr.f32.gmra.mrb[30].mxu0 %v1141_v46 }
 0x3a9   :  { %1791 = vmatprep.mubr.msk.f32.mxu0 %vm2106_vm2, %v2107_v2 }
 0x3ac   :  { %1792 = vmatmul.mubr.f32.gmra.mrb[32].mxu0 %v1140_v42 }
 0x447   :  { %v1092_v23 = vpop.f32.mrb[24].mxu1 }
 0x448   :  { %v1734_v57 = vpop.f32.mrb[25].mxu1 }
 0x44c   :  { %v1097_v58 = vpop.f32.mrb[26].mxu1 }
 0x44d   :  { %v1737_v59 = vpop.f32.mrb[27].mxu1 }
 0x44f   :  { %v1002_v60 = vpop.f32.mrb[14].mxu0 }
 0x450   :  { %v1093_v19 = vadd.f32 %v1092_v23, %v1002_v60  ;;  %v1687_v61 = vpop.f32.mrb[15].mxu0  ;;  %v1102_v62 = vpop.f32.mrb[28].mxu1 }
 0x451   :  { %v1740_v63 = vpop.f32.mrb[29].mxu1 }
 0x453   :  { %v1007_v0 = vpop.f32.mrb[16].mxu0 }
 0x454   :  { %v1098_v1 = vadd.f32 %v1097_v58, %v1007_v0  ;;  %v1690_v3 = vpop.f32.mrb[17].mxu0  ;;  %v1107_v4 = vpop.f32.mrb[30].mxu1 }
 0x455   :  { %v1743_v5 = vpop.f32.mrb[31].mxu1 }
 0x457   :  { %v1012_v6 = vpop.f32.mrb[18].mxu0 }
 0x458   :  { %v1103_v7 = vadd.f32 %v1102_v62, %v1012_v6  ;;  %v1693_v8 = vpop.f32.mrb[19].mxu0  ;;  %v1112_v9 = vpop.f32.mrb[32].mxu1 }
 0x459   :  { %v1746_v2 = vpop.f32.mrb[33].mxu1 }
 0x45d   :  { %v1017_v10 = vpop.f32.mrb[20].mxu0 }
 0x45e   :  { %v1108_v11 = vadd.f32 %v1107_v4, %v1017_v10  ;;  %v1696_v12 = vpop.f32.mrb[21].mxu0 }
 0x461   :  { %v1022_v13 = vpop.f32.mrb[22].mxu0 }
 0x462   :  { %v1113_v14 = vadd.f32 %v1112_v9, %v1022_v13  ;;  %v1699_v15 = vpop.f32.mrb[23].mxu0 }
 0x46f   :  { %v1213_v16 = vpop.f32.mrb[24].mxu0 }
 0x470   :  { %v1237_v18 = vadd.f32 %v1213_v16, %v1093_v19  ;;  %v1781_v20 = vpop.f32.mrb[25].mxu0 }
 0x472   :  { %v1249_v21 = vadd.f32 %v1311_v17, %v1237_v18 }
 0x473   :  { %v1218_v22 = vpop.f32.mrb[26].mxu0 }
 0x474   :  { %vm1254_vm14 = vcmp.gt.f32.partialorder %v1249_v21, 0.0  ;;  %v1259_v24 = vmul.f32 0.01, %v1249_v21  ;;  %v1238_v25 = vadd.f32 %v1218_v22, %v1098_v1  ;;  %v1784_v26 = vpop.f32.mrb[27].mxu0 }
 0x476   :  { %v1264_v27 = vsel %vm1254_vm14, %v1249_v21, %v1259_v24  ;;  %v1250_v28 = vadd.f32 %v1311_v17, %v1238_v25 }
 0x477   :  { %1269 = vst [vmem:[#allocation10] sm:$0xff] %v1264_v27  ;;  %v1223_v29 = vpop.f32.mrb[28].mxu0 }
 0x478   :  { %vm1255_vm15 = vcmp.gt.f32.partialorder %v1250_v28, 0.0  ;;  %v1260_v30 = vmul.f32 0.01, %v1250_v28  ;;  %v1239_v31 = vadd.f32 %v1223_v29, %v1103_v7  ;;  %v1787_v32 = vpop.f32.mrb[29].mxu0 }
 0x47a   :  { %v1265_v33 = vsel %vm1255_vm15, %v1250_v28, %v1260_v30  ;;  %v1251_v34 = vadd.f32 %v1311_v17, %v1239_v31 }
 0x47b   :  { %1270 = vst [vmem:[#allocation10 + $0x8] sm:$0xff] %v1265_v33  ;;  %v1228_v35 = vpop.f32.mrb[30].mxu0 }
 0x47c   :  { %vm1256_vm0 = vcmp.gt.f32.partialorder %v1251_v34, 0.0  ;;  %v1261_v36 = vmul.f32 0.01, %v1251_v34  ;;  %v1240_v37 = vadd.f32 %v1228_v35, %v1108_v11  ;;  %v1790_v38 = vpop.f32.mrb[31].mxu0 }
 0x47e   :  { %v1266_v39 = vsel %vm1256_vm0, %v1251_v34, %v1261_v36  ;;  %v1252_v40 = vadd.f32 %v1311_v17, %v1240_v37 }
 0x47f   :  { %1272 = vst [vmem:[#allocation10 + $0xe] sm:$0xfc] %v1266_v39  ;;  %v1233_v41 = vpop.f32.mrb[32].mxu0 }
 0x480   :  { %vm1257_vm1 = vcmp.gt.f32.partialorder %v1252_v40, 0.0  ;;  %v1262_v42 = vmul.f32 0.01, %v1252_v40  ;;  %v1241_v43 = vadd.f32 %v1233_v41, %v1113_v14  ;;  %v1793_v44 = vpop.f32.mrb[33].mxu0 }
 0x482   :  { %v1267_v45 = vsel %vm1257_vm1, %v1252_v40, %v1262_v42  ;;  %v1253_v46 = vadd.f32 %v1311_v17, %v1241_v43 }
 0x483   :  { %1273 = vst [vmem:[#allocation10 + $0x16] sm:$0xff] %v1267_v45 }
 0x484   :  { %vm1258_vm2 = vcmp.gt.f32.partialorder %v1253_v46, 0.0  ;;  %v1263_v47 = vmul.f32 0.01, %v1253_v46 }
 0x486   :  { %v1268_v48 = vsel %vm1258_vm2, %v1253_v46, %v1263_v47 }
 0x487   :  { %1274 = vst [vmem:[#allocation10 + $0x1e] sm:$0x3] %v1268_v48 }
 0x488   :  { %2080 = shalt.err (!%p2077_p8)
}
 0x489   :  { %s2081_s30 = scalar_lea.hbm %s2467_s9, 512 }
 0x48a   :  { %p2082_p9 = scmp.ne.s32.totalorder %s2467_s9, %s2081_s30  ;;  %p2085_p10 = scmp.lt.u32.totalorder %s2081_s30, %s2467_s9 }
 0x48c   :  { %p2087_p11 = pnand %p2085_p10, %p2082_p9 }
 0x48e   :  { %2090 = shalt.err (!%p2087_p11)
}
 0x48f   :  { %1286 = dma.vmem_to_hbm [thread:$0]  %s1281_s12, 512, %s2467_s9, [#allocation4], %s2101_s21, %s2101_s21, %s2102_s22  }
 0x490   :  { %2097 = dma.done.wait [#allocation4], 512  }
 0x491   :  { %2098 = vsyncadd [#allocation4], 4294966784 }
 0x492   :  { %1290 = vsyncpa [#allocation3], 1 }
 0x493   :  { %1291 = vsyncpa [#allocation6], 1 }
 0x494   :  { %1292 = vsyncpa [#allocation9], 1 }
 0x495   :  { %1293 = vsyncpa [#allocation4], 1 }

</bundles_post_ra>
